<compile_context>
chip_gen: v7x
topology: tpu7x:2x2x1
jax: 0.10.0
libtpu: 0.0.40
codegen_flags: <defaults>
</compile_context>

<pallas_src>
import functools

import jax
import jax.numpy as jnp
import numpy as np
from jax.experimental import pallas as pl
from jax.experimental.pallas import tpu as pltpu


def _tap_masks(N, cin, H, W):
    """Host-side (9*cin, N*H*W) f32 validity masks, row t*cin + c for tap t = dh*3+dw.

    A tap is valid at flat lane l (image n = l // (H*W), position p = l % (H*W),
    h = p // W, w = p % W) iff (h+dh-1, w+dw-1) lies inside the image.  These
    masks therefore zero the conv's halo AND every pltpu.roll wrap, including
    wraps across the image seam introduced by folding the batch into the lanes.
    """
    HW = H * W
    p = np.arange(N * HW) % HW
    hh = p // W
    ww = p % W
    rows = []
    for dh in range(3):
        for dw in range(3):
            hs = hh + dh - 1
            ws = ww + dw - 1
            valid = (hs >= 0) & (hs < H) & (ws >= 0) & (ws < W)
            rows.append(valid.astype(np.float32))
    m9 = np.stack(rows, axis=0)                # (9, N*HW)
    return np.repeat(m9, cin, axis=0)          # (9*cin, N*HW), tap-major/channel-minor


def resblock_kernel(x_ref, w1_ref, b1_ref, w2_ref, b2_ref, m_ref, o_ref,
                    patch_ref, *, W):
    # x_ref    : (Cin, N*H*W)  activations, batch+spatial folded on the lane axis
    # w*_ref   : (Cout, 9*Cin) im2col weights (tap-major, channel-minor columns)
    # b*_ref   : (Cout, 1)
    # m_ref    : (9*Cin, N*H*W) f32 tap-validity masks
    # o_ref    : (Cout, N*H*W)
    # patch_ref: (9*Cin, N*H*W) VMEM scratch for the im2col stack (reused by both convs)
    nhw = x_ref.shape[1]
    # roll so that shifted[l] = x[l + (dh-1)*W + (dw-1)] for in-image lanes
    shifts = [((1 - dh) * W + (1 - dw)) % nhw
              for dh in range(3) for dw in range(3)]

    def conv3x3(x, w_ref, b_ref):
        # x: (Cin, NHW) f32 -> (Cout, NHW) f32 ; 3x3, stride 1, zero pad 1, + bias
        cin = x.shape[0]
        for t, shift in enumerate(shifts):
            xs = x if shift == 0 else pltpu.roll(x, shift, 1)   # XLU lane rotate
            patch_ref[t * cin:(t + 1) * cin, :] = xs            # static sub-tile store
        # NaN-safe zero halo (jnp.where, not multiply); also kills every roll wrap.
        patches = jnp.where(m_ref[...] > 0.5, patch_ref[...], 0.0)
        acc = jnp.dot(w_ref[...], patches,                      # single MXU matmul
                      preferred_element_type=jnp.float32,
                      precision=jax.lax.Precision.HIGHEST)
        return acc + b_ref[...]                                  # bias broadcast

    x = x_ref[...]                                               # (Cin, NHW)
    h1 = jnp.maximum(conv3x3(x, w1_ref, b1_ref), 0.0)            # conv1 + ReLU
    h2 = jnp.maximum(conv3x3(h1, w2_ref, b2_ref), 0.0)           # conv2 + ReLU
    y = h2 + x                                                   # identity shortcut
    o_ref[...] = jnp.where(y >= 0.0, y, 0.01 * y)                # LeakyReLU(0.01)


@jax.jit
def resblock_forward(x_nchw, params):
    """x_nchw: (N, C, H, W) f32; params: (w1, b1, w2, b2) with w* in OIHW (PyTorch)."""
    w1, b1, w2, b2 = params
    N, C, H, W = x_nchw.shape
    Co = w1.shape[0]
    assert C == Co, "default ResBlock config uses an identity shortcut (Cin == Cout)"
    HW = H * W
    NHW = N * HW

    # Fold batch into the lane axis: (N,C,H,W) -> (C, N*H*W).  The transpose is a
    # few-KiB XLA-side layout step; every other reshape is free.
    xr = jnp.transpose(x_nchw.reshape(N, C, HW), (1, 0, 2)).reshape(C, NHW)
    xr = xr.astype(jnp.float32)

    # One-time im2col weight layout: W_k[co, (dh*3+dw)*Cin + c] = w[co, c, dh, dw].
    w1k = jnp.transpose(w1, (0, 2, 3, 1)).reshape(Co, 9 * C).astype(jnp.float32)
    w2k = jnp.transpose(w2, (0, 2, 3, 1)).reshape(Co, 9 * Co).astype(jnp.float32)
    b1k = b1.reshape(Co, 1).astype(jnp.float32)
    b2k = b2.reshape(Co, 1).astype(jnp.float32)
    masks = jnp.asarray(_tap_masks(N, C, H, W))                  # (9*C, NHW) f32 constant

    kernel = functools.partial(resblock_kernel, W=W)

    out = pl.pallas_call(
        kernel,
        out_shape=jax.ShapeDtypeStruct((Co, NHW), jnp.float32),
        grid_spec=pltpu.PrefetchScalarGridSpec(
            num_scalar_prefetch=0,
            grid=(1,),                                           # single fused step
            in_specs=[
                pl.BlockSpec((C, NHW), lambda i: (0, 0)),
                pl.BlockSpec((Co, 9 * C), lambda i: (0, 0)),
                pl.BlockSpec((Co, 1), lambda i: (0, 0)),
                pl.BlockSpec((Co, 9 * Co), lambda i: (0, 0)),
                pl.BlockSpec((Co, 1), lambda i: (0, 0)),
                pl.BlockSpec((9 * C, NHW), lambda i: (0, 0)),
            ],
            out_specs=pl.BlockSpec((Co, NHW), lambda i: (0, 0)),
            scratch_shapes=[pltpu.VMEM((9 * C, NHW), jnp.float32)],
        ),
        compiler_params=pltpu.CompilerParams(
            dimension_semantics=("arbitrary",)),
    )(xr, w1k, b1k, w2k, b2k, masks)

    # (Co, N*HW) -> (N, Co, H, W)
    return jnp.transpose(out.reshape(Co, N, HW), (1, 0, 2)).reshape(N, Co, H, W)


def resblock_reference(x_nchw, params):
    """Pure-JAX reference matching the PyTorch forward (default config)."""
    w1, b1, w2, b2 = params
    dn = ("NCHW", "OIHW", "NCHW")

    def conv(x, w, b):
        y = jax.lax.conv_general_dilated(
            x, w, window_strides=(1, 1), padding=((1, 1), (1, 1)),
            dimension_numbers=dn, precision=jax.lax.Precision.HIGHEST)
        return y + b.reshape(1, -1, 1, 1)

    h = jax.nn.relu(conv(x_nchw, w1, b1))
    h = jax.nn.relu(conv(h, w2, b2))
    y = h + x_nchw                                               # identity shortcut
    return jnp.where(y >= 0.0, y, 0.01 * y)                      # LeakyReLU(0.01)


if __name__ == "__main__":
    key = jax.random.PRNGKey(0)
    kx, k1, kb1, k2, kb2 = jax.random.split(key, 5)

    N, C, H, W = 2, 4, 16, 16          # in_channels == out_channels (identity shortcut)
    Co = C

    x = jax.random.normal(kx, (N, C, H, W), dtype=jnp.float32)
    w1 = 0.1 * jax.random.normal(k1, (Co, C, 3, 3), dtype=jnp.float32)   # OIHW (PyTorch)
    b1 = 0.05 * jax.random.normal(kb1, (Co,), dtype=jnp.float32)
    w2 = 0.1 * jax.random.normal(k2, (Co, Co, 3, 3), dtype=jnp.float32)
    b2 = 0.05 * jax.random.normal(kb2, (Co,), dtype=jnp.float32)
    params = (w1, b1, w2, b2)

    y = resblock_forward(x, params)
    jax.block_until_ready(y)

    y_ref = resblock_reference(x, params)
    np.testing.assert_allclose(np.asarray(y), np.asarray(y_ref), rtol=1e-3, atol=1e-3)

    print("KERNEL_OK")
</pallas_src>

<mosaic_0001>
module attributes {stable_mosaic.version = 11 : i64} {
  func.func @resblock_kernel(%arg0: i32, %arg1: memref<4x512xf32, #tpu.memory_space<vmem>>, %arg2: memref<4x36xf32, #tpu.memory_space<vmem>>, %arg3: memref<4x1xf32, #tpu.memory_space<vmem>>, %arg4: memref<4x36xf32, #tpu.memory_space<vmem>>, %arg5: memref<4x1xf32, #tpu.memory_space<vmem>>, %arg6: memref<36x512xf32, #tpu.memory_space<vmem>>, %arg7: memref<4x512xf32, #tpu.memory_space<vmem>>, %arg8: memref<36x512xf32, #tpu.memory_space<vmem>>) attributes {dimension_semantics = [#tpu.dimension_semantics<arbitrary>], iteration_bounds = array<i64: 1>, scalar_prefetch = 0 : i64, scratch_operands = 1 : i64, tpu.core_type = #tpu.core_type<tc>, window_params = [{pipeline_mode = #tpu.pipeline_mode<synchronous>, transform_indices = @transform_0, window_bounds = array<i64: 4, 512>}, {pipeline_mode = #tpu.pipeline_mode<synchronous>, transform_indices = @transform_1, window_bounds = array<i64: 4, 36>}, {pipeline_mode = #tpu.pipeline_mode<synchronous>, transform_indices = @transform_2, window_bounds = array<i64: 4, 1>}, {pipeline_mode = #tpu.pipeline_mode<synchronous>, transform_indices = @transform_3, window_bounds = array<i64: 4, 36>}, {pipeline_mode = #tpu.pipeline_mode<synchronous>, transform_indices = @transform_4, window_bounds = array<i64: 4, 1>}, {pipeline_mode = #tpu.pipeline_mode<synchronous>, transform_indices = @transform_5, window_bounds = array<i64: 36, 512>}, {pipeline_mode = #tpu.pipeline_mode<synchronous>, transform_indices = @transform_6, window_bounds = array<i64: 4, 512>}]} {
    %c0 = arith.constant 0 : index
    %c0_0 = arith.constant 0 : index
    %0 = vector.load %arg1[%c0, %c0_0] : memref<4x512xf32, #tpu.memory_space<vmem>>, vector<4x512xf32>
    %c17_i32 = arith.constant 17 : i32
    %1 = tpu.dynamic_rotate %0 by %c17_i32 dim 1 : vector<4x512xf32>, i32 -> vector<4x512xf32>
    %c0_1 = arith.constant 0 : index
    %c0_2 = arith.constant 0 : index
    %2 = vector.load %arg8[%c0_1, %c0_2] : memref<36x512xf32, #tpu.memory_space<vmem>>, vector<4x512xf32>
    tpu.vector_store %arg8[%c0_1, %c0_2], %1 {strides = array<i32>} : memref<36x512xf32, #tpu.memory_space<vmem>>, vector<4x512xf32>,
    %c16_i32 = arith.constant 16 : i32
    %3 = tpu.dynamic_rotate %0 by %c16_i32 dim 1 : vector<4x512xf32>, i32 -> vector<4x512xf32>
    %c4 = arith.constant 4 : index
    %c0_3 = arith.constant 0 : index
    %4 = vector.load %arg8[%c4, %c0_3] : memref<36x512xf32, #tpu.memory_space<vmem>>, vector<4x512xf32>
    tpu.vector_store %arg8[%c4, %c0_3], %3 {strides = array<i32>} : memref<36x512xf32, #tpu.memory_space<vmem>>, vector<4x512xf32>,
    %c15_i32 = arith.constant 15 : i32
    %5 = tpu.dynamic_rotate %0 by %c15_i32 dim 1 : vector<4x512xf32>, i32 -> vector<4x512xf32>
    %c8 = arith.constant 8 : index
    %c0_4 = arith.constant 0 : index
    %6 = vector.load %arg8[%c8, %c0_4] : memref<36x512xf32, #tpu.memory_space<vmem>>, vector<4x512xf32>
    tpu.vector_store %arg8[%c8, %c0_4], %5 {strides = array<i32>} : memref<36x512xf32, #tpu.memory_space<vmem>>, vector<4x512xf32>,
    %c1_i32 = arith.constant 1 : i32
    %7 = tpu.dynamic_rotate %0 by %c1_i32 dim 1 : vector<4x512xf32>, i32 -> vector<4x512xf32>
    %c12 = arith.constant 12 : index
    %c0_5 = arith.constant 0 : index
    %8 = vector.load %arg8[%c12, %c0_5] : memref<36x512xf32, #tpu.memory_space<vmem>>, vector<4x512xf32>
    tpu.vector_store %arg8[%c12, %c0_5], %7 {strides = array<i32>} : memref<36x512xf32, #tpu.memory_space<vmem>>, vector<4x512xf32>,
    %c16 = arith.constant 16 : index
    %c0_6 = arith.constant 0 : index
    %9 = vector.load %arg8[%c16, %c0_6] : memref<36x512xf32, #tpu.memory_space<vmem>>, vector<4x512xf32>
    tpu.vector_store %arg8[%c16, %c0_6], %0 {strides = array<i32>} : memref<36x512xf32, #tpu.memory_space<vmem>>, vector<4x512xf32>,
    %c511_i32 = arith.constant 511 : i32
    %10 = tpu.dynamic_rotate %0 by %c511_i32 dim 1 : vector<4x512xf32>, i32 -> vector<4x512xf32>
    %c20 = arith.constant 20 : index
    %c0_7 = arith.constant 0 : index
    %11 = vector.load %arg8[%c20, %c0_7] : memref<36x512xf32, #tpu.memory_space<vmem>>, vector<4x512xf32>
    tpu.vector_store %arg8[%c20, %c0_7], %10 {strides = array<i32>} : memref<36x512xf32, #tpu.memory_space<vmem>>, vector<4x512xf32>,
    %c497_i32 = arith.constant 497 : i32
    %12 = tpu.dynamic_rotate %0 by %c497_i32 dim 1 : vector<4x512xf32>, i32 -> vector<4x512xf32>
    %c24 = arith.constant 24 : index
    %c0_8 = arith.constant 0 : index
    %13 = vector.load %arg8[%c24, %c0_8] : memref<36x512xf32, #tpu.memory_space<vmem>>, vector<4x512xf32>
    tpu.vector_store %arg8[%c24, %c0_8], %12 {strides = array<i32>} : memref<36x512xf32, #tpu.memory_space<vmem>>, vector<4x512xf32>,
    %c496_i32 = arith.constant 496 : i32
    %14 = tpu.dynamic_rotate %0 by %c496_i32 dim 1 : vector<4x512xf32>, i32 -> vector<4x512xf32>
    %c28 = arith.constant 28 : index
    %c0_9 = arith.constant 0 : index
    %15 = vector.load %arg8[%c28, %c0_9] : memref<36x512xf32, #tpu.memory_space<vmem>>, vector<4x512xf32>
    tpu.vector_store %arg8[%c28, %c0_9], %14 {strides = array<i32>} : memref<36x512xf32, #tpu.memory_space<vmem>>, vector<4x512xf32>,
    %c495_i32 = arith.constant 495 : i32
    %16 = tpu.dynamic_rotate %0 by %c495_i32 dim 1 : vector<4x512xf32>, i32 -> vector<4x512xf32>
    %c32 = arith.constant 32 : index
    %c0_10 = arith.constant 0 : index
    %17 = vector.load %arg8[%c32, %c0_10] : memref<36x512xf32, #tpu.memory_space<vmem>>, vector<4x512xf32>
    tpu.vector_store %arg8[%c32, %c0_10], %16 {strides = array<i32>} : memref<36x512xf32, #tpu.memory_space<vmem>>, vector<4x512xf32>,
    %c0_11 = arith.constant 0 : index
    %c0_12 = arith.constant 0 : index
    %18 = vector.load %arg6[%c0_11, %c0_12] : memref<36x512xf32, #tpu.memory_space<vmem>>, vector<36x512xf32>
    %cst = arith.constant 5.000000e-01 : f32
    %19 = vector.broadcast %cst : f32 to vector<36x512xf32>
    %20 = arith.cmpf ogt, %18, %19 : vector<36x512xf32>
    %c0_13 = arith.constant 0 : index
    %c0_14 = arith.constant 0 : index
    %21 = vector.load %arg8[%c0_13, %c0_14] : memref<36x512xf32, #tpu.memory_space<vmem>>, vector<36x512xf32>
    %cst_15 = arith.constant 0.000000e+00 : f32
    %22 = vector.broadcast %cst_15 : f32 to vector<36x512xf32>
    %23 = arith.select %20, %21, %22 : vector<36x512xi1>, vector<36x512xf32>
    %c0_16 = arith.constant 0 : index
    %c0_17 = arith.constant 0 : index
    %24 = vector.load %arg2[%c0_16, %c0_17] : memref<4x36xf32, #tpu.memory_space<vmem>>, vector<4x36xf32>
    %cst_18 = arith.constant dense<0.000000e+00> : vector<4x512xf32>
    %25 = tpu.matmul %24, %23, %cst_18 {dimension_numbers = #tpu.dot_dimension_numbers<[1], [0], [0], [1], [0, 0, 1, 1], [], []>, precision = #tpu.contract_precision<fp32>} : vector<4x36xf32>, vector<36x512xf32>, vector<4x512xf32> -> vector<4x512xf32>
    %c0_19 = arith.constant 0 : index
    %c0_20 = arith.constant 0 : index
    %26 = vector.load %arg3[%c0_19, %c0_20] : memref<4x1xf32, #tpu.memory_space<vmem>>, vector<4x1xf32>
    %27 = vector.broadcast %26 : vector<4x1xf32> to vector<4x512xf32>
    %28 = arith.addf %25, %27 : vector<4x512xf32>
    %cst_21 = arith.constant 0.000000e+00 : f32
    %29 = vector.broadcast %cst_21 : f32 to vector<4x512xf32>
    %30 = arith.maximumf %28, %29 : vector<4x512xf32>
    %c17_i32_22 = arith.constant 17 : i32
    %31 = tpu.dynamic_rotate %30 by %c17_i32_22 dim 1 : vector<4x512xf32>, i32 -> vector<4x512xf32>
    %c0_23 = arith.constant 0 : index
    %c0_24 = arith.constant 0 : index
    %32 = vector.load %arg8[%c0_23, %c0_24] : memref<36x512xf32, #tpu.memory_space<vmem>>, vector<4x512xf32>
    tpu.vector_store %arg8[%c0_23, %c0_24], %31 {strides = array<i32>} : memref<36x512xf32, #tpu.memory_space<vmem>>, vector<4x512xf32>,
    %c16_i32_25 = arith.constant 16 : i32
    %33 = tpu.dynamic_rotate %30 by %c16_i32_25 dim 1 : vector<4x512xf32>, i32 -> vector<4x512xf32>
    %c4_26 = arith.constant 4 : index
    %c0_27 = arith.constant 0 : index
    %34 = vector.load %arg8[%c4_26, %c0_27] : memref<36x512xf32, #tpu.memory_space<vmem>>, vector<4x512xf32>
    tpu.vector_store %arg8[%c4_26, %c0_27], %33 {strides = array<i32>} : memref<36x512xf32, #tpu.memory_space<vmem>>, vector<4x512xf32>,
    %c15_i32_28 = arith.constant 15 : i32
    %35 = tpu.dynamic_rotate %30 by %c15_i32_28 dim 1 : vector<4x512xf32>, i32 -> vector<4x512xf32>
    %c8_29 = arith.constant 8 : index
    %c0_30 = arith.constant 0 : index
    %36 = vector.load %arg8[%c8_29, %c0_30] : memref<36x512xf32, #tpu.memory_space<vmem>>, vector<4x512xf32>
    tpu.vector_store %arg8[%c8_29, %c0_30], %35 {strides = array<i32>} : memref<36x512xf32, #tpu.memory_space<vmem>>, vector<4x512xf32>,
    %c1_i32_31 = arith.constant 1 : i32
    %37 = tpu.dynamic_rotate %30 by %c1_i32_31 dim 1 : vector<4x512xf32>, i32 -> vector<4x512xf32>
    %c12_32 = arith.constant 12 : index
    %c0_33 = arith.constant 0 : index
    %38 = vector.load %arg8[%c12_32, %c0_33] : memref<36x512xf32, #tpu.memory_space<vmem>>, vector<4x512xf32>
    tpu.vector_store %arg8[%c12_32, %c0_33], %37 {strides = array<i32>} : memref<36x512xf32, #tpu.memory_space<vmem>>, vector<4x512xf32>,
    %c16_34 = arith.constant 16 : index
    %c0_35 = arith.constant 0 : index
    %39 = vector.load %arg8[%c16_34, %c0_35] : memref<36x512xf32, #tpu.memory_space<vmem>>, vector<4x512xf32>
    tpu.vector_store %arg8[%c16_34, %c0_35], %30 {strides = array<i32>} : memref<36x512xf32, #tpu.memory_space<vmem>>, vector<4x512xf32>,
    %c511_i32_36 = arith.constant 511 : i32
    %40 = tpu.dynamic_rotate %30 by %c511_i32_36 dim 1 : vector<4x512xf32>, i32 -> vector<4x512xf32>
    %c20_37 = arith.constant 20 : index
    %c0_38 = arith.constant 0 : index
    %41 = vector.load %arg8[%c20_37, %c0_38] : memref<36x512xf32, #tpu.memory_space<vmem>>, vector<4x512xf32>
    tpu.vector_store %arg8[%c20_37, %c0_38], %40 {strides = array<i32>} : memref<36x512xf32, #tpu.memory_space<vmem>>, vector<4x512xf32>,
    %c497_i32_39 = arith.constant 497 : i32
    %42 = tpu.dynamic_rotate %30 by %c497_i32_39 dim 1 : vector<4x512xf32>, i32 -> vector<4x512xf32>
    %c24_40 = arith.constant 24 : index
    %c0_41 = arith.constant 0 : index
    %43 = vector.load %arg8[%c24_40, %c0_41] : memref<36x512xf32, #tpu.memory_space<vmem>>, vector<4x512xf32>
    tpu.vector_store %arg8[%c24_40, %c0_41], %42 {strides = array<i32>} : memref<36x512xf32, #tpu.memory_space<vmem>>, vector<4x512xf32>,
    %c496_i32_42 = arith.constant 496 : i32
    %44 = tpu.dynamic_rotate %30 by %c496_i32_42 dim 1 : vector<4x512xf32>, i32 -> vector<4x512xf32>
    %c28_43 = arith.constant 28 : index
    %c0_44 = arith.constant 0 : index
    %45 = vector.load %arg8[%c28_43, %c0_44] : memref<36x512xf32, #tpu.memory_space<vmem>>, vector<4x512xf32>
    tpu.vector_store %arg8[%c28_43, %c0_44], %44 {strides = array<i32>} : memref<36x512xf32, #tpu.memory_space<vmem>>, vector<4x512xf32>,
    %c495_i32_45 = arith.constant 495 : i32
    %46 = tpu.dynamic_rotate %30 by %c495_i32_45 dim 1 : vector<4x512xf32>, i32 -> vector<4x512xf32>
    %c32_46 = arith.constant 32 : index
    %c0_47 = arith.constant 0 : index
    %47 = vector.load %arg8[%c32_46, %c0_47] : memref<36x512xf32, #tpu.memory_space<vmem>>, vector<4x512xf32>
    tpu.vector_store %arg8[%c32_46, %c0_47], %46 {strides = array<i32>} : memref<36x512xf32, #tpu.memory_space<vmem>>, vector<4x512xf32>,
    %c0_48 = arith.constant 0 : index
    %c0_49 = arith.constant 0 : index
    %48 = vector.load %arg6[%c0_48, %c0_49] : memref<36x512xf32, #tpu.memory_space<vmem>>, vector<36x512xf32>
    %cst_50 = arith.constant 5.000000e-01 : f32
    %49 = vector.broadcast %cst_50 : f32 to vector<36x512xf32>
    %50 = arith.cmpf ogt, %48, %49 : vector<36x512xf32>
    %c0_51 = arith.constant 0 : index
    %c0_52 = arith.constant 0 : index
    %51 = vector.load %arg8[%c0_51, %c0_52] : memref<36x512xf32, #tpu.memory_space<vmem>>, vector<36x512xf32>
    %cst_53 = arith.constant 0.000000e+00 : f32
    %52 = vector.broadcast %cst_53 : f32 to vector<36x512xf32>
    %53 = arith.select %50, %51, %52 : vector<36x512xi1>, vector<36x512xf32>
    %c0_54 = arith.constant 0 : index
    %c0_55 = arith.constant 0 : index
    %54 = vector.load %arg4[%c0_54, %c0_55] : memref<4x36xf32, #tpu.memory_space<vmem>>, vector<4x36xf32>
    %cst_56 = arith.constant dense<0.000000e+00> : vector<4x512xf32>
    %55 = tpu.matmul %54, %53, %cst_56 {dimension_numbers = #tpu.dot_dimension_numbers<[1], [0], [0], [1], [0, 0, 1, 1], [], []>, precision = #tpu.contract_precision<fp32>} : vector<4x36xf32>, vector<36x512xf32>, vector<4x512xf32> -> vector<4x512xf32>
    %c0_57 = arith.constant 0 : index
    %c0_58 = arith.constant 0 : index
    %56 = vector.load %arg5[%c0_57, %c0_58] : memref<4x1xf32, #tpu.memory_space<vmem>>, vector<4x1xf32>
    %57 = vector.broadcast %56 : vector<4x1xf32> to vector<4x512xf32>
    %58 = arith.addf %55, %57 : vector<4x512xf32>
    %cst_59 = arith.constant 0.000000e+00 : f32
    %59 = vector.broadcast %cst_59 : f32 to vector<4x512xf32>
    %60 = arith.maximumf %58, %59 : vector<4x512xf32>
    %61 = arith.addf %60, %0 : vector<4x512xf32>
    %cst_60 = arith.constant 0.000000e+00 : f32
    %62 = vector.broadcast %cst_60 : f32 to vector<4x512xf32>
    %63 = arith.cmpf oge, %61, %62 : vector<4x512xf32>
    %cst_61 = arith.constant 0.00999999977 : f32
    %64 = vector.broadcast %cst_61 : f32 to vector<4x512xf32>
    %65 = arith.mulf %64, %61 : vector<4x512xf32>
    %66 = arith.select %63, %61, %65 : vector<4x512xi1>, vector<4x512xf32>
    %c0_62 = arith.constant 0 : index
    %c0_63 = arith.constant 0 : index
    %67 = vector.load %arg7[%c0_62, %c0_63] : memref<4x512xf32, #tpu.memory_space<vmem>>, vector<4x512xf32>
    tpu.vector_store %arg7[%c0_62, %c0_63], %66 {strides = array<i32>} : memref<4x512xf32, #tpu.memory_space<vmem>>, vector<4x512xf32>,
    return
  }
  func.func @transform_0(%arg0: i32) -> (i32, i32) {
    %c0_i32 = arith.constant 0 : i32
    %c0_i32_0 = arith.constant 0 : i32
    %c0_i32_1 = arith.constant 0 : i32
    return %c0_i32, %c0_i32_0 : i32, i32
  }
  func.func @transform_1(%arg0: i32) -> (i32, i32) {
    %c0_i32 = arith.constant 0 : i32
    %c0_i32_0 = arith.constant 0 : i32
    %c0_i32_1 = arith.constant 0 : i32
    return %c0_i32, %c0_i32_0 : i32, i32
  }
  func.func @transform_2(%arg0: i32) -> (i32, i32) {
    %c0_i32 = arith.constant 0 : i32
    %c0_i32_0 = arith.constant 0 : i32
    %c0_i32_1 = arith.constant 0 : i32
    return %c0_i32, %c0_i32_0 : i32, i32
  }
  func.func @transform_3(%arg0: i32) -> (i32, i32) {
    %c0_i32 = arith.constant 0 : i32
    %c0_i32_0 = arith.constant 0 : i32
    %c0_i32_1 = arith.constant 0 : i32
    return %c0_i32, %c0_i32_0 : i32, i32
  }
  func.func @transform_4(%arg0: i32) -> (i32, i32) {
    %c0_i32 = arith.constant 0 : i32
    %c0_i32_0 = arith.constant 0 : i32
    %c0_i32_1 = arith.constant 0 : i32
    return %c0_i32, %c0_i32_0 : i32, i32
  }
  func.func @transform_5(%arg0: i32) -> (i32, i32) {
    %c0_i32 = arith.constant 0 : i32
    %c0_i32_0 = arith.constant 0 : i32
    %c0_i32_1 = arith.constant 0 : i32
    return %c0_i32, %c0_i32_0 : i32, i32
  }
  func.func @transform_6(%arg0: i32) -> (i32, i32) {
    %c0_i32 = arith.constant 0 : i32
    %c0_i32_0 = arith.constant 0 : i32
    %c0_i32_1 = arith.constant 0 : i32
    return %c0_i32, %c0_i32_0 : i32, i32
  }
}

</mosaic_0001>

<bundles_post_ra>
// kernel: resblock_forward.1
= control target key start
LH: loop header
LB: loop body
LE: loop exit
PB: predicated region body
PF: predicated region fallthrough
CT: control target
= control target key end

     0   :  { %s3174_s25 = smov 16   ;;  %s3176_s26 = smov 17   ;;  %v4424_v4 = vmov 0.0   ;;  %v39_v5 = vlaneseq  ;;  %v3183_v11 = vmov 0   ;;  %vm308_vm6 = vcmask 293888   ;;  %s4400_s0 = inlined_call_operand.vmem [shape: f32[4,512], index: 0, kind: input, shape index: {}]   ;;  %s4401_s2 = inlined_call_operand.vmem [shape: f32[4,1], index: 2, kind: input, shape index: {}]   ;;  %s4402_s5 = inlined_call_operand.vmem [shape: f32[36,512], index: 5, kind: input, shape index: {}]   ;;  %s4403_s1 = inlined_call_operand.vmem [shape: f32[4,36], index: 1, kind: input, shape index: {}]   ;;  %s4404_s4 = inlined_call_operand.vmem [shape: f32[4,1], index: 4, kind: input, shape index: {}]   ;;  %s4405_s3 = inlined_call_operand.vmem [shape: f32[4,36], index: 3, kind: input, shape index: {}]   ;;  %s4406_s6 = inlined_call_operand.vmem [shape: f32[4,512], index: 6, kind: output, shape index: {}]  }
   0x1   :  { %v3222_v0 = vld [vmem:[%s4400_s0 + $0x8] sm:$0xff]  ;;  %v3227_v1 = vld [vmem:[%s4400_s0] sm:$0xff]  ;;  %s3175_s0 = smov 1   ;;  %s3177_s27 = smov 15   ;;  %399 = vmatprep.mubr.f32.mxu0 %v4424_v4  ;;  %968 = vmatprep.mubr.f32.mxu1 %v4424_v4  ;;  %v3368_v53 = vld [vmem:[%s4402_s5 + $0x18] sm:$0xff] }
   0x2   :  { %4458 = vst [vmem:[#allocation3_spill] sm:$0xff] %v3222_v0  ;;  %4459 = vst [vmem:[#allocation4_spill] sm:$0xff] %v3227_v1  ;;  %54 = vrot.lane.b32.xlu1 %v3222_v0, %s3174_s25  ;;  %50 = vrot.lane.b32.xlu0 %v3227_v1, %s3174_s25  ;;  %v3237_v2 = vcombine.high %v3222_v0, %v3222_v0  ;;  %v3241_v3 = vcombine.high %v3227_v1, %v3227_v1  ;;  %s3178_s28 = smov 127   ;;  %s3179_s29 = smov 112   ;;  %v3307_v6 = vand.u32 127, %v39_v5  ;;  %v3345_v44 = vld [vmem:[%s4402_s5 + $0x8] sm:$0xff] }
   0x3   :  { %127 = vst [vmem:[#allocation2 + $0x50] sm:$0xf] %v3222_v0  ;;  %125 = vst [vmem:[#allocation2 + $0x40] sm:$0xf] %v3227_v1  ;;  %s3180_s30 = smov 113   ;;  %s3181_s7 = smov 111   ;;  %3171 = vset.pattern.permute.xlu0 %v3183_v11 }
   0x4   :  { %4460 = vst [vmem:[#allocation5_spill] sm:$0xff] %v3237_v2  ;;  %4461 = vst [vmem:[#allocation6_spill] sm:$0xff] %v3241_v3  ;;  %vm58_vm0 = vcmp.lt.s32.totalorder %v3307_v6, 16  ;;  %vm104_vm1 = vcmp.lt.s32.totalorder %v3307_v6, 1  ;;  %v302_v12 = vld [vmem:[%s4401_s2] sm:$0xf] }
   0x5   :  { %128 = vst [vmem:[#allocation2 + $0x58] sm:$0xf] %v3237_v2  ;;  %126 = vst [vmem:[#allocation2 + $0x48] sm:$0xf] %v3241_v3  ;;  %vm41_vm2 = vcmp.lt.s32.totalorder %v3307_v6, 17  ;;  %vm87_vm3 = vcmp.lt.s32.totalorder %v3307_v6, 15 }
   0x6   :  { %56 = vrot.lane.b32.xlu1 %v3237_v2, %s3174_s25  ;;  %52 = vrot.lane.b32.xlu0 %v3241_v3, %s3174_s25  ;;  %v3350_v47 = vld [vmem:[%s4402_s5 + $0x28] sm:$0xff]  ;;  %vm242_vm4 = vcmp.gt.f32.partialorder %v3345_v44, 0.5  ;;  %vm4415_vm5 = vcmp.lt.s32.totalorder %v3307_v6, 127  ;;  %v3363_v52 = vld [vmem:[%s4402_s5] sm:$0xff]  ;;  %vm4410_vm9 = vcmp.gt.f32.partialorder %v3368_v53, 0.5  ;;  %vm4408_vm14 = vcmp.lt.s32.totalorder %v3307_v6, 112 }
   0x7   :  { %v301_v54 = vld [vmem:[%s4403_s1] sm:$0xf]  ;;  %vm4414_vm7 = vcmp.gt.f32.partialorder %v3350_v47, 0.5  ;;  %v3382_v56 = vld [vmem:[%s4402_s5 + $0x10] sm:$0xff]  ;;  %v3389_v60 = vld [vmem:[%s4402_s5 + $0x38] sm:$0xff]  ;;  %vm4413_vm8 = vcmp.gt.f32.partialorder %v3363_v52, 0.5 }
   0x8   :  { %v3377_v55 = vld [vmem:[%s4402_s5 + $0x20] sm:$0xff]  ;;  %4462 = vst [vmem:[#allocation7_spill] sm:$0xff] %v3389_v60  ;;  %v3394_v61 = vld [vmem:[%s4402_s5 + $0x30] sm:$0xff]  ;;  %vm4412_vm11 = vcmp.gt.f32.partialorder %v3382_v56, 0.5  ;;  %vm4407_vm12 = vcmp.gt.f32.partialorder %v3389_v60, 0.5  ;;  %vm4430_vm15 = vcmp.lt.s32.totalorder %v3307_v6, 113 }
   0x9   :  { %vm4409_vm10 = vcmp.gt.f32.partialorder %v3377_v55, 0.5  ;;  %vm4411_vm13 = vcmp.gt.f32.partialorder %v3394_v61, 0.5 }
   0xa   :  { %98 = vrot.lane.b32.xlu1 %v3241_v3, %s3175_s0  ;;  %96 = vrot.lane.b32.xlu0 %v3227_v1, %s3175_s0 }
   0xe   :  { %102 = vrot.lane.b32.xlu1 %v3237_v2, %s3175_s0  ;;  %100 = vrot.lane.b32.xlu0 %v3222_v0, %s3175_s0 }
  0x12   :  { %33 = vrot.lane.b32.xlu1 %v3241_v3, %s3176_s26  ;;  %31 = vrot.lane.b32.xlu0 %v3227_v1, %s3176_s26 }
  0x16   :  { %37 = vrot.lane.b32.xlu1 %v3237_v2, %s3176_s26  ;;  %35 = vrot.lane.b32.xlu0 %v3222_v0, %s3176_s26 }
  0x1a   :  { %81 = vrot.lane.b32.xlu1 %v3241_v3, %s3177_s27  ;;  %79 = vrot.lane.b32.xlu0 %v3227_v1, %s3177_s27 }
  0x1e   :  { %85 = vrot.lane.b32.xlu1 %v3237_v2, %s3177_s27  ;;  %83 = vrot.lane.b32.xlu0 %v3222_v0, %s3177_s27 }
  0x22   :  { %131 = vrot.lane.b32.xlu1 %v3241_v3, %s3178_s28  ;;  %129 = vrot.lane.b32.xlu0 %v3227_v1, %s3178_s28 }
  0x26   :  { %135 = vrot.lane.b32.xlu1 %v3237_v2, %s3178_s28  ;;  %133 = vrot.lane.b32.xlu0 %v3222_v0, %s3178_s28 }
  0x2a   :  { %177 = vrot.lane.b32.xlu1 %v3241_v3, %s3179_s29  ;;  %175 = vrot.lane.b32.xlu0 %v3227_v1, %s3179_s29 }
  0x2e   :  { %181 = vrot.lane.b32.xlu1 %v3237_v2, %s3179_s29  ;;  %179 = vrot.lane.b32.xlu0 %v3222_v0, %s3179_s29 }
  0x32   :  { %160 = vrot.lane.b32.xlu1 %v3241_v3, %s3180_s30  ;;  %158 = vrot.lane.b32.xlu0 %v3227_v1, %s3180_s30 }
  0x36   :  { %164 = vrot.lane.b32.xlu1 %v3237_v2, %s3180_s30  ;;  %162 = vrot.lane.b32.xlu0 %v3222_v0, %s3180_s30 }
  0x3a   :  { %206 = vrot.lane.b32.xlu1 %v3241_v3, %s3181_s7  ;;  %204 = vrot.lane.b32.xlu0 %v3227_v1, %s3181_s7 }
  0x3e   :  { %210 = vrot.lane.b32.xlu1 %v3237_v2, %s3181_s7  ;;  %208 = vrot.lane.b32.xlu0 %v3222_v0, %s3181_s7 }
  0x42   :  { %305 = vperm.xlu0 %3171, %v302_v12  }
  0x74   :  { %v55_v7 = vpop.permute.xlu1 %54  ;;  %v51_v8 = vpop.permute.xlu0 %50 }
  0x78   :  { %v57_v9 = vpop.permute.xlu1 %56  ;;  %v53_v10 = vpop.permute.xlu0 %52 }
  0x79   :  { %v59_v13 = vsel %vm58_vm0, %v55_v7, %v57_v9  ;;  %v62_v14 = vsel %vm58_vm0, %v57_v9, %v51_v8  ;;  %v60_v15 = vsel %vm58_vm0, %v53_v10, %v55_v7  ;;  %v61_v16 = vsel %vm58_vm0, %v51_v8, %v53_v10 }
  0x7a   :  { %v67_v17 = vrot.slane %v62_v14, 4  ;;  %v70_v18 = vrot.slane %v59_v13, 4  ;;  %v68_v19 = vrot.slane %v61_v16, 4  ;;  %v69_v20 = vrot.slane %v60_v15, 4 }
  0x7b   :  { %v310_v8 = vsel %vm308_vm6, %v301_v54, 0 }
  0x7c   :  { %75 = vst [vmem:[#allocation2] sm:$0xf0] %v67_v17  ;;  %78 = vst [vmem:[#allocation2 + $0x18] sm:$0xf0] %v70_v18  ;;  %v99_v21 = vpop.permute.xlu1 %98  ;;  %v97_v22 = vpop.permute.xlu0 %96  ;;  %v3412_v18 = vand.u32 4294901760, %v310_v8 }
  0x7d   :  { %76 = vst [vmem:[#allocation2 + $0x8] sm:$0xf0] %v68_v19  ;;  %77 = vst [vmem:[#allocation2 + $0x10] sm:$0xf0] %v69_v20  ;;  %v107_v23 = vsel %vm104_vm1, %v97_v22, %v99_v21 }
  0x7e   :  { %v114_v24 = vrot.slane %v107_v23, 4 }
  0x80   :  { %122 = vst [vmem:[#allocation2 + $0x28] sm:$0xf0] %v114_v24  ;;  %v103_v25 = vpop.permute.xlu1 %102  ;;  %v101_v26 = vpop.permute.xlu0 %100 }
  0x81   :  { %v108_v27 = vsel %vm104_vm1, %v103_v25, %v97_v22  ;;  %v105_v28 = vsel %vm104_vm1, %v101_v26, %v103_v25  ;;  %v106_v29 = vsel %vm104_vm1, %v99_v21, %v101_v26 }
  0x82   :  { %v113_v30 = vrot.slane %v108_v27, 4  ;;  %v115_v31 = vrot.slane %v106_v29, 4  ;;  %v116_v32 = vrot.slane %v105_v28, 4 }
  0x84   :  { %121 = vst [vmem:[#allocation2 + $0x20] sm:$0xf0] %v113_v30  ;;  %123 = vst [vmem:[#allocation2 + $0x30] sm:$0xf0] %v115_v31  ;;  %v34_v33 = vpop.permute.xlu1 %33  ;;  %v32_v34 = vpop.permute.xlu0 %31 }
  0x85   :  { %124 = vst [vmem:[#allocation2 + $0x38] sm:$0xf0] %v116_v32  ;;  %v44_v35 = vsel %vm41_vm2, %v32_v34, %v34_v33 }
  0x86   :  { %47 = vst [vmem:[#allocation2 + $0x8] sm:$0xf] %v44_v35 }
  0x88   :  { %v38_v36 = vpop.permute.xlu1 %37  ;;  %v36_v37 = vpop.permute.xlu0 %35 }
  0x89   :  { %v45_v38 = vsel %vm41_vm2, %v38_v36, %v32_v34  ;;  %v42_v39 = vsel %vm41_vm2, %v36_v37, %v38_v36  ;;  %v43_v40 = vsel %vm41_vm2, %v34_v33, %v36_v37 }
  0x8a   :  { %46 = vst [vmem:[#allocation2] sm:$0xf] %v45_v38  ;;  %48 = vst [vmem:[#allocation2 + $0x10] sm:$0xf] %v43_v40 }
  0x8b   :  { %49 = vst [vmem:[#allocation2 + $0x18] sm:$0xf] %v42_v39 }
  0x8c   :  { %v82_v41 = vpop.permute.xlu1 %81  ;;  %v80_v42 = vpop.permute.xlu0 %79 }
  0x8d   :  { %v90_v43 = vsel %vm87_vm3, %v80_v42, %v82_v41  ;;  %v262_v51 = vld [vmem:[#allocation2 + $0x8] sm:$0xff] }
  0x8e   :  { %93 = vst [vmem:[#allocation2 + $0x28] sm:$0xf] %v90_v43  ;;  %v282_v59 = vsel %vm242_vm4, %v262_v51, 0.0 }
  0x8f   :  { %v325_v11 = vand.u32 4294901760, %v282_v59 }
  0x90   :  { %v86_v45 = vpop.permute.xlu1 %85  ;;  %v84_v46 = vpop.permute.xlu0 %83 }
  0x91   :  { %v91_v48 = vsel %vm87_vm3, %v86_v45, %v80_v42  ;;  %v88_v49 = vsel %vm87_vm3, %v84_v46, %v86_v45  ;;  %v89_v50 = vsel %vm87_vm3, %v82_v41, %v84_v46  ;;  %v261_v5 = vld [vmem:[#allocation2] sm:$0xff]  ;;  %v263_v13 = vld [vmem:[#allocation2 + $0x10] sm:$0xff]  ;;  %v3454_v51 = vsub.f32 %v282_v59, %v325_v11 }
  0x92   :  { %92 = vst [vmem:[#allocation2 + $0x20] sm:$0xf] %v91_v48  ;;  %94 = vst [vmem:[#allocation2 + $0x30] sm:$0xf] %v89_v50  ;;  %v264_v7 = vld [vmem:[#allocation2 + $0x18] sm:$0xff]  ;;  %v281_v16 = vsel %vm4413_vm8, %v261_v5, 0.0  ;;  %v3452_v50 = vsub.f32 %v310_v8, %v3412_v18 }
  0x93   :  { %95 = vst [vmem:[#allocation2 + $0x38] sm:$0xf] %v88_v49  ;;  %v284_v17 = vsel %vm4410_vm9, %v264_v7, 0.0  ;;  %v283_v29 = vsel %vm4412_vm11, %v263_v13, 0.0  ;;  %v327_v31 = vand.u32 4294901760, %v281_v16  ;;  %v3439_v42 = vld [vmem:[%s4402_s5 + $0x40] sm:$0xff] }
  0x94   :  { %v132_v57 = vpop.permute.xlu1 %131  ;;  %v130_v58 = vpop.permute.xlu0 %129  ;;  %v894_v37 = vand.u32 4294901760, %v284_v17  ;;  %v896_v41 = vand.u32 4294901760, %v283_v29  ;;  %4463 = vst [vmem:[#allocation8_spill] sm:$0xff] %v3439_v42  ;;  %v3472_v5 = vld [vmem:[%s4402_s5 + $0x48] sm:$0xff]  ;;  %v3477_v7 = vld [vmem:[%s4402_s5 + $0x58] sm:$0xff]  ;;  %v3484_v13 = vld [vmem:[%s4402_s5 + $0x50] sm:$0xff] }
  0x95   :  { %v140_v62 = vsel %vm4415_vm5, %v130_v58, %v132_v57  ;;  %v266_v63 = vld [vmem:[#allocation2 + $0x28] sm:$0xff]  ;;  %4464 = vst [vmem:[#allocation9_spill] sm:$0xff] %v3472_v5  ;;  %4465 = vst [vmem:[#allocation10_spill] sm:$0xff] %v3477_v7  ;;  %vm212_vm9 = vcmp.lt.s32.totalorder %v3307_v6, 111 }
  0x96   :  { %v146_v9 = vrot.slane %v140_v62, 4  ;;  %v286_v10 = vsel %vm4414_vm7, %v266_v63, 0.0  ;;  %v3479_v8 = vsub.f32 %v284_v17, %v894_v37  ;;  %4466 = vst [vmem:[#allocation11_spill] sm:$0xff] %v3484_v13 }
  0x97   :  { %v329_v12 = vand.u32 4294901760, %v286_v10 }
  0x98   :  { %154 = vst [vmem:[#allocation2 + $0x40] sm:$0xf0] %v146_v9  ;;  %v136_v14 = vpop.permute.xlu1 %135  ;;  %v134_v15 = vpop.permute.xlu0 %133 }
  0x99   :  { %v141_v19 = vsel %vm4415_vm5, %v136_v14, %v130_v58  ;;  %v138_v20 = vsel %vm4415_vm5, %v134_v15, %v136_v14  ;;  %v139_v21 = vsel %vm4415_vm5, %v132_v57, %v134_v15  ;;  %v3420_v22 = vpack.c.bf16 %v329_v12, %v325_v11  ;;  %v265_v23 = vld [vmem:[#allocation2 + $0x20] sm:$0xff]  ;;  %v267_v25 = vld [vmem:[#allocation2 + $0x30] sm:$0xff] }
  0x9a   :  { %v268_v24 = vld [vmem:[#allocation2 + $0x38] sm:$0xff]  ;;  %v149_v26 = vrot.slane %v141_v19, 4  ;;  %v147_v27 = vrot.slane %v139_v21, 4  ;;  %v148_v28 = vrot.slane %v138_v20, 4  ;;  %v285_v30 = vsel %vm4409_vm10, %v265_v23, 0.0  ;;  %v3502_v23 = vld [vmem:[%s4402_s5 + $0x68] sm:$0xff] }
  0x9b   :  { %2922 = vmatprep.subr.bf16.mxu0 %v3420_v22  ;;  %v288_v32 = vsel %vm4407_vm12, %v268_v24, 0.0  ;;  %v3431_v33 = vsel %vm4411_vm13, %v267_v25, 0.0  ;;  %v331_v36 = vand.u32 4294901760, %v285_v30  ;;  %v3445_v48 = vsub.f32 %v286_v10, %v329_v12  ;;  %4468 = vst [vmem:[#allocation13_spill] sm:$0xff] %v3502_v23  ;;  %v3508_v24 = vld [vmem:[%s4402_s5 + $0x78] sm:$0xff]  ;;  %v3514_v25 = vld [vmem:[%s4402_s5 + $0x70] sm:$0xff] }
  0x9c   :  { %157 = vst [vmem:[#allocation2 + $0x58] sm:$0xf0] %v149_v26  ;;  %155 = vst [vmem:[#allocation2 + $0x48] sm:$0xf0] %v147_v27  ;;  %v178_v34 = vpop.permute.xlu1 %177  ;;  %v176_v35 = vpop.permute.xlu0 %175  ;;  %v898_v38 = vand.u32 4294901760, %v288_v32  ;;  %v900_v39 = vand.u32 4294901760, %v3431_v33  ;;  %v3460_v58 = vsub.f32 %v281_v16, %v327_v31  ;;  %v3488_v15 = vsub.f32 %v283_v29, %v896_v41 }
  0x9d   :  { %156 = vst [vmem:[#allocation2 + $0x50] sm:$0xf0] %v148_v28  ;;  %v186_v40 = vsel %vm4408_vm14, %v176_v35, %v178_v34  ;;  %v3441_v45 = vpack.c.bf16 %v331_v36, %v327_v31  ;;  %vm4431_vm12 = vcmp.gt.f32.partialorder %v3439_v42, 0.5  ;;  %v3486_v14 = vsub.f32 %v285_v30, %v331_v36  ;;  %v3493_v16 = vld [vmem:[%s4402_s5 + $0x60] sm:$0xff]  ;;  %4469 = vst [vmem:[#allocation14_spill] sm:$0xff] %v3508_v24 }
  0x9e   :  { %v192_v43 = vrot.slane %v186_v40, 4  ;;  %v3443_v46 = vpack.c.bf16 %v898_v38, %v894_v37  ;;  %v3449_v49 = vpack.c.bf16 %v900_v39, %v896_v41  ;;  %4467 = vst [vmem:[#allocation12_spill] sm:$0xff] %v3493_v16  ;;  %v4422_v17 = vand.u32 4294901760, %v3445_v48  ;;  %4470 = vst [vmem:[#allocation15_spill] sm:$0xff] %v3514_v25 }
  0x9f   :  { %2924 = vmatpush1.bf16.msra.mxu0 %v3441_v45  ;;  %v269_v12 = vld [vmem:[#allocation2 + $0x40] sm:$0xff]  ;;  %v3497_v19 = vand.u32 4294901760, %v3452_v50  ;;  %vm4418_vm10 = vcmp.gt.f32.partialorder %v3477_v7, 0.5  ;;  %v4423_v26 = vand.u32 4294901760, %v3454_v51  ;;  %vm4416_vm13 = vcmp.gt.f32.partialorder %v3484_v13, 0.5 }
  0xa0   :  { %200 = vst [vmem:[#allocation2 + $0x60] sm:$0xf0] %v192_v43  ;;  %2970 = vmatprep.subr.bf16.mxu1 %v3443_v46  ;;  %v182_v54 = vpop.permute.xlu1 %181  ;;  %v180_v57 = vpop.permute.xlu0 %179  ;;  %v3522_v29 = vsel %vm4431_vm12, %v269_v12, 0.0  ;;  %v3525_v30 = vsub.f32 %v288_v32, %v898_v38  ;;  %vm253_vm11 = vcmp.gt.f32.partialorder %v3493_v16, 0.5  ;;  %vm254_vm8 = vcmp.gt.f32.partialorder %v3502_v23, 0.5 }
  0xa1   :  { %v187_v62 = vsel %vm4408_vm14, %v182_v54, %v176_v35  ;;  %2972 = vmatpush1.bf16.msra.mxu1 %v3449_v49  ;;  %v184_v59 = vsel %vm4408_vm14, %v180_v57, %v182_v54  ;;  %v185_v63 = vsel %vm4408_vm14, %v178_v34, %v180_v57  ;;  %vm4432_vm14 = vcmp.gt.f32.partialorder %v3472_v5, 0.5 }
  0xa2   :  { %v195_v9 = vrot.slane %v187_v62, 4  ;;  %v193_v10 = vrot.slane %v185_v63, 4  ;;  %v194_v11 = vrot.slane %v184_v59, 4  ;;  %v4421_v34 = vand.u32 4294901760, %v3479_v8  ;;  %v3553_v59 = vld [vmem:[%s4402_s5 + $0x80] sm:$0xf] }
  0xa3   :  { %v270_v28 = vld [vmem:[#allocation2 + $0x48] sm:$0xff]  ;;  %v272_v31 = vld [vmem:[#allocation2 + $0x58] sm:$0xff]  ;;  %v4417_v35 = vand.u32 4294901760, %v3460_v58  ;;  %vm256_vm7 = vcmp.gt.f32.partialorder %v3508_v24, 0.5  ;;  %vm255_vm5 = vcmp.gt.f32.partialorder %v3514_v25, 0.5  ;;  %v426_v32 = vsub.f32 %v3445_v48, %v4422_v17 }
  0xa4   :  { %203 = vst [vmem:[#allocation2 + $0x78] sm:$0xf0] %v195_v9  ;;  %201 = vst [vmem:[#allocation2 + $0x68] sm:$0xf0] %v193_v10  ;;  %v161_v20 = vpop.permute.xlu1 %160  ;;  %v159_v21 = vpop.permute.xlu0 %158  ;;  %v271_v36 = vld [vmem:[#allocation2 + $0x50] sm:$0xff]  ;;  %v403_v37 = vsub.f32 %v3452_v50, %v3497_v19  ;;  %v4420_v38 = vand.u32 4294901760, %v3486_v14  ;;  %v3543_v41 = vsub.f32 %v3431_v33, %v900_v39  ;;  %v414_v63 = vsub.f32 %v3454_v51, %v4423_v26 }
  0xa5   :  { %202 = vst [vmem:[#allocation2 + $0x70] sm:$0xf0] %v194_v11  ;;  %v169_v27 = vsel %vm4430_vm15, %v159_v21, %v161_v20  ;;  %v4419_v40 = vand.u32 4294901760, %v3488_v15  ;;  %v3547_v57 = vsel %vm4432_vm14, %v270_v28, 0.0  ;;  %v4426_v62 = vand.u32 4294901760, %v3522_v29 }
  0xa6   :  { %171 = vst [vmem:[#allocation2 + $0x60] sm:$0xf] %v169_v27  ;;  %v3566_v10 = vsel %vm4418_vm10, %v272_v31, 0.0  ;;  %v3570_v11 = vsel %vm4416_vm13, %v271_v36, 0.0  ;;  %v3575_v12 = vsub.f32 %v3479_v8, %v4421_v34  ;;  %v3584_v27 = vld [vmem:[%s4402_s5 + $0x88] sm:$0xf]  ;;  %v432_v36 = vsub.f32 %v3486_v14, %v4420_v38 }
  0xa7   :  { %v3589_v28 = vld [vmem:[%s4402_s5 + $0x98] sm:$0xf]  ;;  %vm257_vm13 = vcmp.gt.f32.partialorder %v3553_v59, 0.5  ;;  %v427_v31 = vand.u32 4294901760, %v426_v32  ;;  %vm312_vm10 = vcmask 1043456   ;;  %v904_v17 = vand.u32 4294901760, %v3570_v11 }
  0xa8   :  { %v165_v43 = vpop.permute.xlu1 %164  ;;  %v163_v54 = vpop.permute.xlu0 %162  ;;  %v3610_v32 = vld [vmem:[%s4402_s5 + $0x90] sm:$0xf]  ;;  %v415_v26 = vand.u32 4294901760, %v414_v63  ;;  %v3616_v4 = vand.u32 4294901760, %v403_v37  ;;  %v4471_v2 = vand.u32 4294901760, %v3525_v30  ;;  %vm260_vm12 = vcmp.gt.f32.partialorder %v3589_v28, 0.5 }
  0xa9   :  { %v170_v33 = vsel %vm4430_vm15, %v165_v43, %v159_v21  ;;  %v167_v39 = vsel %vm4430_vm15, %v163_v54, %v165_v43  ;;  %v168_v9 = vsel %vm4430_vm15, %v161_v20, %v163_v54  ;;  %v420_v20 = vsub.f32 %v3460_v58, %v4417_v35 }
  0xaa   :  { %174 = vst [vmem:[#allocation2 + $0x78] sm:$0xf] %v170_v33  ;;  %172 = vst [vmem:[#allocation2 + $0x68] sm:$0xf] %v168_v9  ;;  %v3598_v43 = vsub.f32 %v3488_v15, %v4419_v40  ;;  %v902_v9 = vand.u32 4294901760, %v3566_v10  ;;  %v3605_v35 = vsub.f32 %v3522_v29, %v4426_v62  ;;  %v984_v21 = vand.u32 4294901760, %v3575_v12 }
  0xab   :  { %173 = vst [vmem:[#allocation2 + $0x70] sm:$0xf] %v167_v39  ;;  %v333_v39 = vand.u32 4294901760, %v3547_v57  ;;  %v995_v0 = vsub.f32 %v3525_v30, %v4471_v2  ;;  %v421_v40 = vand.u32 4294901760, %v420_v20  ;;  %vm258_vm15 = vcmp.gt.f32.partialorder %v3584_v27, 0.5 }
  0xac   :  { %v207_v54 = vpop.permute.xlu1 %206  ;;  %v205_v33 = vpop.permute.xlu0 %204  ;;  %vm259_vm14 = vcmp.gt.f32.partialorder %v3610_v32, 0.5  ;;  %v3627_v37 = vpack.c.bf16 %v427_v31, %v415_v26  ;;  %v3634_v2 = vsub.f32 %v3566_v10, %v902_v9  ;;  %v4472_v20 = vand.u32 4294901760, %v3543_v41 }
  0xad   :  { %v215_v38 = vsel %vm212_vm9, %v205_v33, %v207_v54  ;;  %v273_v34 = vld [vmem:[#allocation2 + $0x60] sm:$0xff]  ;;  %v3631_v12 = vsub.f32 %v3547_v57, %v333_v39  ;;  %v3649_v7 = vsub.f32 %v3570_v11, %v904_v17  ;;  %v996_v13 = vand.u32 4294901760, %v995_v0 }
  0xae   :  { %217 = vst [vmem:[#allocation2 + $0x80] sm:$0xf] %v215_v38  ;;  %v293_v62 = vsel %vm253_vm11, %v273_v34, 0.0  ;;  %v433_v38 = vand.u32 4294901760, %v432_v36  ;;  %v3639_v16 = vsub.f32 %v3543_v41, %v4472_v20 }
  0xaf   :  { %v339_v3 = vand.u32 4294901760, %v293_v62 }
  0xb0   :  { %v211_v34 = vpop.permute.xlu1 %210  ;;  %v209_v1 = vpop.permute.xlu0 %208  ;;  %v3659_v11 = vpack.c.bf16 %v433_v38, %v421_v40 }
  0xb1   :  { %v216_v26 = vsel %vm212_vm9, %v211_v34, %v205_v33  ;;  %v213_v31 = vsel %vm212_vm9, %v209_v1, %v211_v34  ;;  %v214_v57 = vsel %vm212_vm9, %v207_v54, %v209_v1  ;;  %v274_v36 = vld [vmem:[#allocation2 + $0x68] sm:$0xff]  ;;  %v276_v63 = vld [vmem:[#allocation2 + $0x78] sm:$0xff]  ;;  %v3657_v42 = vsub.f32 %v293_v62, %v339_v3 }
  0xb2   :  { %v275_v10 = vld [vmem:[#allocation2 + $0x70] sm:$0xff]  ;;  %220 = vst [vmem:[#allocation2 + $0x98] sm:$0xf] %v216_v26  ;;  %218 = vst [vmem:[#allocation2 + $0x88] sm:$0xf] %v214_v57  ;;  %v294_v20 = vsel %vm254_vm8, %v274_v36, 0.0 }
  0xb3   :  { %219 = vst [vmem:[#allocation2 + $0x90] sm:$0xf] %v213_v31  ;;  %v296_v33 = vsel %vm256_vm7, %v276_v63, 0.0  ;;  %v295_v34 = vsel %vm255_vm5, %v275_v10, 0.0  ;;  %v337_v1 = vand.u32 4294901760, %v294_v20  ;;  %v1002_v26 = vand.u32 4294901760, %v3639_v16 }
  0xb4   :  { %v906_v54 = vand.u32 4294901760, %v296_v33  ;;  %v908_v5 = vand.u32 4294901760, %v295_v34  ;;  %v4441_v31 = vand.u32 4294901760, %v3631_v12  ;;  %v4444_v57 = vand.u32 4294901760, %v3634_v2 }
  0xb5   :  { %v3664_v36 = vpack.c.bf16 %v337_v1, %v333_v39  ;;  %v3666_v63 = vsub.f32 %v294_v20, %v337_v1  ;;  %v277_v10 = vld [vmem:[#allocation2 + $0x80] sm:$0xf]  ;;  %v4473_v62 = vand.u32 4294901760, %v3522_v29 }
  0xb6   :  { %v3668_v25 = vpack.c.bf16 %v906_v54, %v902_v9  ;;  %v3670_v0 = vsub.f32 %v296_v33, %v906_v54  ;;  %v3676_v40 = vpack.c.bf16 %v908_v5, %v904_v17  ;;  %v3678_v16 = vsub.f32 %v295_v34, %v908_v5 }
  0xb7   :  { %v3674_v24 = vpack.c.bf16 %v339_v3, %v4473_v62  ;;  %v297_v38 = vsel %vm257_vm13, %v277_v10, 0.0  ;;  %2926 = vmatprep.subr.bf16.mxu0 %v3664_v36  ;;  %v4442_v9 = vand.u32 4294901760, %v3666_v63  ;;  %v4474_v17 = vand.u32 4294901760, %v3605_v35 }
  0xb8   :  { %2974 = vmatprep.subr.bf16.mxu1 %v3668_v25  ;;  %v314_v39 = vsel %vm312_vm10, %v297_v38, 0  ;;  %v4443_v20 = vand.u32 4294901760, %v3670_v0  ;;  %v2977_v10 = vpack.c.bf16 %v996_v13, %v984_v21  ;;  %v438_v62 = vsub.f32 %v3631_v12, %v4441_v31 }
  0xb9   :  { %2928 = vmatpush1.bf16.msra.mxu0 %v3674_v24  ;;  %2976 = vmatpush1.bf16.msra.mxu1 %v3676_v40  ;;  %v3690_v5 = vand.u32 4294901760, %v314_v39  ;;  %v444_v29 = vsub.f32 %v3605_v35, %v4474_v17  ;;  %v278_v34 = vld [vmem:[#allocation2 + $0x88] sm:$0xf]  ;;  %v280_v1 = vld [vmem:[#allocation2 + $0x98] sm:$0xf]  ;;  %v450_v38 = vsub.f32 %v3666_v63, %v4442_v9  ;;  %v1007_v21 = vsub.f32 %v3634_v2, %v4444_v57 }
  0xba   :  { %v279_v54 = vld [vmem:[#allocation2 + $0x90] sm:$0xf]  ;;  %v1019_v17 = vsub.f32 %v3670_v0, %v4443_v20  ;;  %v298_v59 = vsel %vm258_vm15, %v278_v34, 0.0  ;;  %v300_v33 = vsel %vm260_vm12, %v280_v1, 0.0  ;;  %v4475_v20 = vand.u32 4294901760, %v3657_v42 }
  0xbb   :  { %v299_v13 = vsel %vm259_vm14, %v279_v54, 0.0  ;;  %v317_v31 = vsel %vm312_vm10, %v298_v59, 0  ;;  %v323_v9 = vsel %vm312_vm10, %v300_v33, 0  ;;  %v3726_v32 = vsub.f32 %v314_v39, %v3690_v5 }
  0xbc   :  { %v320_v3 = vsel %vm312_vm10, %v299_v13, 0  ;;  %v456_v27 = vsub.f32 %v3657_v42, %v4475_v20  ;;  %v3721_v34 = vand.u32 4294901760, %v317_v31  ;;  %v3723_v28 = vand.u32 4294901760, %v323_v9 }
  0xbd   :  { %v3728_v1 = vand.u32 4294901760, %v320_v3  ;;  %v4476_v54 = vand.u32 4294901760, %v3598_v43  ;;  %v451_v57 = vand.u32 4294901760, %v450_v38  ;;  %v1020_v33 = vand.u32 4294901760, %v1019_v17 }
  0xbe   :  { %v4477_v13 = vand.u32 4294901760, %v3678_v16  ;;  %342 = vmatprep.subr.mxu0 %v3721_v34  ;;  %911 = vmatprep.subr.mxu1 %v3723_v28  ;;  %v4478_v39 = vand.u32 4294901760, %v3649_v7  ;;  %v3744_v43 = vsub.f32 %v317_v31, %v3721_v34  ;;  %v1008_v38 = vand.u32 4294901760, %v1007_v21 }
  0xbf   :  { %v2979_v59 = vpack.c.bf16 %v1002_v26, %v4476_v54  ;;  %v3738_v20 = vsub.f32 %v320_v3, %v3728_v1  ;;  %344 = vmatpush1.msra.mxu0 %v3690_v5  ;;  %913 = vmatpush1.msra.mxu1 %v3728_v1  ;;  %v439_v26 = vand.u32 4294901760, %v438_v62  ;;  %v457_v17 = vand.u32 4294901760, %v456_v27 }
  0xc0   :  { %v1025_v23 = vsub.f32 %v3678_v16, %v4477_v13  ;;  %v1013_v60 = vsub.f32 %v3649_v7, %v4478_v39  ;;  %v3749_v54 = vsub.f32 %v323_v9, %v3723_v28  ;;  %2930 = vmatprep.subr.bf16.mxu0 %v3627_v37  ;;  %2978 = vmatprep.subr.bf16.mxu1 %v2977_v10  ;;  %v461_v13 = vand.u32 4294901760, %v3744_v43 }
  0xc1   :  { %v467_v39 = vand.u32 4294901760, %v3726_v32  ;;  %v1036_v31 = vand.u32 4294901760, %v3738_v20  ;;  %405 = vmatmul.mubr.f32.vlgmr.msra.gmra.mrb[0].mxu0 %v3616_v4  ;;  %974 = vmatmul.mubr.f32.vlgmr.msra.gmra.mrb[0].mxu1 %v3616_v4  ;;  %v2933_v62 = vpack.c.bf16 %v451_v57, %v439_v26  ;;  %v2981_v21 = vpack.c.bf16 %v1020_v33, %v1008_v38 }
  0xc2   :  { %v1026_v3 = vand.u32 4294901760, %v1025_v23  ;;  %v445_v27 = vand.u32 4294901760, %v444_v29  ;;  %v1030_v9 = vand.u32 4294901760, %v3749_v54  ;;  %2932 = vmatpush1.bf16.msra.mxu0 %v3659_v11  ;;  %2980 = vmatpush1.bf16.msra.mxu1 %v2979_v59  ;;  %v1014_v37 = vand.u32 4294901760, %v1013_v60 }
  0xc3   :  { %v462_v23 = vsub.f32 %v3744_v43, %v461_v13  ;;  %2934 = vmatprep.subr.bf16.mxu0 %v2933_v62  ;;  %2982 = vmatprep.subr.bf16.mxu1 %v2981_v21  ;;  %v468_v29 = vsub.f32 %v3726_v32, %v467_v39  ;;  %v1037_v60 = vsub.f32 %v3738_v20, %v1036_v31  ;;  %v4479_v11 = vmov 0.0  }
  0xc4   :  { %v2935_v10 = vpack.c.bf16 %v457_v17, %v445_v27  ;;  %v1031_v4 = vsub.f32 %v3749_v54, %v1030_v9  ;;  %v2983_v57 = vpack.c.bf16 %v1026_v3, %v1014_v37  ;;  %525 = vmatprep.mubr.f32.mxu0 %v4479_v11  ;;  %1094 = vmatprep.mubr.f32.mxu1 %v4479_v11  ;;  %vm4504_vm14 = vcmp.gt.f32.partialorder %v3368_v53, 0.5 }
  0xc5   :  { %v463_v33 = vand.u32 4294901760, %v462_v23  ;;  %v469_v26 = vand.u32 4294901760, %v468_v29  ;;  %v1038_v38 = vand.u32 4294901760, %v1037_v60  ;;  %v2937_v17 = vpack.c.bf16 %v3445_v48, %v3454_v51 }
  0xc6   :  { %v1032_v59 = vand.u32 4294901760, %v1031_v4  ;;  %2936 = vmatpush1.bf16.msra.mxu0 %v2935_v10  ;;  %2984 = vmatpush1.bf16.msra.mxu1 %v2983_v57  ;;  %v2985_v3 = vpack.c.bf16 %v3525_v30, %v3479_v8  ;;  %v2939_v62 = vpack.c.bf16 %v3486_v14, %v3460_v58  ;;  %v2987_v21 = vpack.c.bf16 %v3543_v41, %v3488_v15 }
  0xc7   :  { %464 = vmatprep.subr.mxu0 %v463_v33  ;;  %v2941_v27 = vpack.c.bf16 %v3666_v63, %v3631_v12  ;;  %v2989_v37 = vpack.c.bf16 %v3670_v0, %v3634_v2  ;;  %v2943_v23 = vpack.c.bf16 %v3657_v42, %v3605_v35  ;;  %v2991_v10 = vpack.c.bf16 %v3678_v16, %v3649_v7 }
  0xc8   :  { %1033 = vmatprep.subr.mxu1 %v1032_v59  ;;  %v4481_v4 = vand.u32 4294901760, %v3445_v48  ;;  %v4482_v33 = vand.u32 4294901760, %v3479_v8  ;;  %v4483_v29 = vand.u32 4294901760, %v3525_v30  ;;  %v4484_v59 = vand.u32 4294901760, %v3460_v58 }
  0xc9   :  { %v4487_v48 = vand.u32 4294901760, %v3543_v41  ;;  %v4488_v8 = vand.u32 4294901760, %v3631_v12  ;;  %v4489_v30 = vand.u32 4294901760, %v3666_v63  ;;  %v4491_v58 = vand.u32 4294901760, %v3670_v0 }
  0xca   :  { %470 = vmatpush1.msra.mxu0 %v469_v26  ;;  %1039 = vmatpush1.msra.mxu1 %v1038_v38  ;;  %v3001_v60 = vpack.c.bf16 %v4483_v29, %v4482_v33  ;;  %v4485_v26 = vand.u32 4294901760, %v3486_v14  ;;  %v4493_v41 = vand.u32 4294901760, %v3657_v42  ;;  %v4495_v12 = vand.u32 4294901760, %v3678_v16 }
  0xcb   :  { %2938 = vmatprep.subr.bf16.mxu0 %v2937_v17  ;;  %2986 = vmatprep.subr.bf16.mxu1 %v2985_v3  ;;  %v2957_v3 = vpack.c.bf16 %v4489_v30, %v4488_v8  ;;  %vm4505_vm15 = vcmp.gt.f32.partialorder %v3377_v55, 0.5 }
  0xcc   :  { %527 = vmatmul.mubr.f32.vlgmr.msra.gmra.mrb[0].mxu0 %v3412_v18  ;;  %1096 = vmatmul.mubr.f32.vlgmr.msra.gmra.mrb[0].mxu1 %v3412_v18  ;;  %v2955_v38 = vpack.c.bf16 %v4485_v26, %v4484_v59 }
  0xcd   :  { %2940 = vmatpush1.bf16.msra.mxu0 %v2939_v62  ;;  %2988 = vmatpush1.bf16.msra.mxu1 %v2987_v21  ;;  %v4490_v62 = vand.u32 4294901760, %v3634_v2 }
  0xce   :  { %2942 = vmatprep.subr.bf16.mxu0 %v2941_v27  ;;  %2990 = vmatprep.subr.bf16.mxu1 %v2989_v37 }
  0xcf   :  { %617 = vmatprep.mubr.f32.mxu0 %v4479_v11  ;;  %1186 = vmatprep.mubr.f32.mxu1 %v4479_v11  ;;  %v3005_v14 = vpack.c.bf16 %v4491_v58, %v4490_v62 }
  0xd1   :  { %2944 = vmatpush1.bf16.msra.mxu0 %v2943_v23  ;;  %2992 = vmatpush1.bf16.msra.mxu1 %v2991_v10 }
  0xd2   :  { %559 = vmatprep.subr.mxu0 %v3744_v43  ;;  %1128 = vmatprep.subr.mxu1 %v3749_v54 }
  0xd5   :  { %562 = vmatpush1.msra.mxu0 %v3726_v32  ;;  %1131 = vmatpush1.msra.mxu1 %v3738_v20 }
  0xd6   :  { %2946 = vmatprep.subr.bf16.mxu0 %v3420_v22  ;;  %2994 = vmatprep.subr.bf16.mxu1 %v3443_v46 }
  0xd7   :  { %620 = vmatmul.mubr.f32.vlgmr.msra.gmra.mrb[0].mxu0 %v3452_v50  ;;  %1189 = vmatmul.mubr.f32.vlgmr.msra.gmra.mrb[0].mxu1 %v3452_v50  ;;  %v4480_v50 = vand.u32 4294901760, %v3454_v51  ;;  %v4486_v51 = vand.u32 4294901760, %v3488_v15  ;;  %v4492_v15 = vand.u32 4294901760, %v3605_v35 }
  0xd8   :  { %2948 = vmatpush1.bf16.msra.mxu0 %v3441_v45  ;;  %2996 = vmatpush1.bf16.msra.mxu1 %v3449_v49 }
  0xd9   :  { %2950 = vmatprep.subr.bf16.mxu0 %v3664_v36  ;;  %2998 = vmatprep.subr.bf16.mxu1 %v3668_v25  ;;  %v2953_v57 = vpack.c.bf16 %v4481_v4, %v4480_v50  ;;  %v3003_v17 = vpack.c.bf16 %v4487_v48, %v4486_v51  ;;  %v2959_v21 = vpack.c.bf16 %v4493_v41, %v4492_v15 }
  0xda   :  { %700 = vmatprep.mubr.f32.mxu0 %v4479_v11  ;;  %1269 = vmatprep.mubr.f32.mxu1 %v4479_v11 }
  0xdc   :  { %2952 = vmatpush1.bf16.msra.mxu0 %v3674_v24  ;;  %3000 = vmatpush1.bf16.msra.mxu1 %v3676_v40 }
  0xdd   :  { %643 = vmatprep.subr.mxu0 %v3721_v34  ;;  %1212 = vmatprep.subr.mxu1 %v3723_v28 }
  0xe0   :  { %645 = vmatpush1.msra.mxu0 %v3690_v5  ;;  %1214 = vmatpush1.msra.mxu1 %v3728_v1 }
  0xe1   :  { %2954 = vmatprep.subr.bf16.mxu0 %v2953_v57  ;;  %3002 = vmatprep.subr.bf16.mxu1 %v3001_v60 }
  0xe2   :  { %704 = vmatmul.mubr.f32.vlgmr.msra.gmra.mrb[0].mxu0 %v3497_v19  ;;  %1273 = vmatmul.mubr.f32.vlgmr.msra.gmra.mrb[0].mxu1 %v3497_v19  ;;  %v4494_v19 = vand.u32 4294901760, %v3649_v7 }
  0xe3   :  { %2956 = vmatpush1.bf16.msra.mxu0 %v2955_v38  ;;  %3004 = vmatpush1.bf16.msra.mxu1 %v3003_v17 }
  0xe4   :  { %2958 = vmatprep.subr.bf16.mxu0 %v2957_v3  ;;  %3006 = vmatprep.subr.bf16.mxu1 %v3005_v14  ;;  %v3007_v63 = vpack.c.bf16 %v4495_v12, %v4494_v19 }
  0xe5   :  { %804 = vmatprep.mubr.f32.mxu0 %v4479_v11  ;;  %1373 = vmatprep.mubr.f32.mxu1 %v4479_v11 }
  0xe7   :  { %2960 = vmatpush1.bf16.msra.mxu0 %v2959_v21  ;;  %3008 = vmatpush1.bf16.msra.mxu1 %v3007_v63 }
  0xe8   :  { %745 = vmatprep.subr.mxu0 %v461_v13  ;;  %1314 = vmatprep.subr.mxu1 %v1030_v9 }
  0xeb   :  { %749 = vmatpush1.msra.mxu0 %v467_v39  ;;  %1318 = vmatpush1.msra.mxu1 %v1036_v31 }
  0xec   :  { %2962 = vmatprep.subr.bf16.mxu0 %v3420_v22  ;;  %3010 = vmatprep.subr.bf16.mxu1 %v3443_v46  ;;  %v306_v22 = vpop.permute.xlu0 %305 }
  0xed   :  { %806 = vmatmul.mubr.f32.vlgmr.msra.gmra.mrb[0].mxu0 %v3412_v18  ;;  %1375 = vmatmul.mubr.f32.vlgmr.msra.gmra.mrb[0].mxu1 %v3412_v18 }
  0xee   :  { %2964 = vmatpush1.bf16.msra.mxu0 %v3441_v45  ;;  %3012 = vmatpush1.bf16.msra.mxu1 %v3449_v49 }
  0xef   :  { %2966 = vmatprep.subr.bf16.mxu0 %v3664_v36  ;;  %3014 = vmatprep.subr.bf16.mxu1 %v3668_v25 }
  0xf0   :  { %886 = vmatprep.mubr.f32.mxu0 %v4479_v11  ;;  %1455 = vmatprep.mubr.f32.mxu1 %v4479_v11 }
  0xf2   :  { %2968 = vmatpush1.bf16.msra.mxu0 %v3674_v24  ;;  %3016 = vmatpush1.bf16.msra.mxu1 %v3676_v40 }
  0xf3   :  { %829 = vmatprep.subr.mxu0 %v3721_v34  ;;  %1398 = vmatprep.subr.mxu1 %v3723_v28 }
  0xf6   :  { %831 = vmatpush1.msra.mxu0 %v3690_v5  ;;  %1400 = vmatpush1.msra.mxu1 %v3728_v1 }
  0xf7   :  { %888 = vmatmul.mubr.f32.vlgmr.msra.gmra.mrb[0].mxu0 %v3412_v18  ;;  %1457 = vmatmul.mubr.f32.vlgmr.msra.gmra.mrb[0].mxu1 %v3412_v18  ;;  %v1728_v18 = vld [vmem:[%s4404_s4] sm:$0xf] }
  0xf8   :  { %1823 = vmatprep.mubr.f32.mxu0 %v4479_v11  ;;  %2392 = vmatprep.mubr.f32.mxu1 %v4479_v11 }
 0x1ca   :  { %v1458_v42 = vpop.f32.mrb[0].mxu1  ;;  %v889_v45 = vpop.f32.mrb[0].mxu0 }
 0x1cb   :  { %v3115_v46 = vadd.f32 %v1458_v42, %v306_v22  ;;  %v3113_v49 = vadd.f32 %v889_v45, %v306_v22  ;;  %v891_v7 = vpop.f32.mrb[1].mxu0  ;;  %v1460_v24 = vpop.f32.mrb[1].mxu1  ;;  %v1727_v45 = vld [vmem:[%s4405_s3] sm:$0xf] }
 0x1cc   :  { %v3114_v25 = vadd.f32 %v891_v7, %v306_v22  ;;  %v3116_v35 = vadd.f32 %v1460_v24, %v306_v22 }
 0x1cd   :  { %v1465_v2 = vmax.f32 %v3115_v46, 0.0  ;;  %v1463_v36 = vmax.f32 %v3113_v49, 0.0 }
 0x1ce   :  { %v1464_v0 = vmax.f32 %v3114_v25, 0.0  ;;  %v1466_v40 = vmax.f32 %v3116_v35, 0.0  ;;  %v1735_v25 = vsel %vm308_vm6, %v1727_v45, 0  ;;  %vm4501_vm6 = vcmp.gt.f32.partialorder %v3394_v61, 0.5 }
 0x1cf   :  { %1557 = vst [vmem:[#allocation2 + $0x50] sm:$0xf] %v1465_v2  ;;  %1555 = vst [vmem:[#allocation2 + $0x40] sm:$0xf] %v1463_v36  ;;  %1487 = vrot.lane.b32.xlu0 %v1465_v2, %s3174_s25  ;;  %1483 = vrot.lane.b32.xlu1 %v1463_v36, %s3174_s25 }
 0x1d0   :  { %1556 = vst [vmem:[#allocation2 + $0x48] sm:$0xf] %v1464_v0  ;;  %1558 = vst [vmem:[#allocation2 + $0x58] sm:$0xf] %v1466_v40 }
 0x1d3   :  { %1527 = vrot.lane.b32.xlu0 %v1463_v36, %s3175_s0  ;;  %1485 = vrot.lane.b32.xlu1 %v1464_v0, %s3174_s25 }
 0x1d7   :  { %1531 = vrot.lane.b32.xlu0 %v1465_v2, %s3175_s0  ;;  %1489 = vrot.lane.b32.xlu1 %v1466_v40, %s3174_s25 }
 0x1db   :  { %1467 = vrot.lane.b32.xlu0 %v1463_v36, %s3176_s26  ;;  %1529 = vrot.lane.b32.xlu1 %v1464_v0, %s3175_s0 }
 0x1df   :  { %1471 = vrot.lane.b32.xlu0 %v1465_v2, %s3176_s26  ;;  %1533 = vrot.lane.b32.xlu1 %v1466_v40, %s3175_s0 }
 0x1e3   :  { %1511 = vrot.lane.b32.xlu0 %v1463_v36, %s3177_s27  ;;  %1469 = vrot.lane.b32.xlu1 %v1464_v0, %s3176_s26 }
 0x1e7   :  { %1515 = vrot.lane.b32.xlu0 %v1465_v2, %s3177_s27  ;;  %1473 = vrot.lane.b32.xlu1 %v1466_v40, %s3176_s26 }
 0x1eb   :  { %1559 = vrot.lane.b32.xlu0 %v1463_v36, %s3178_s28  ;;  %1513 = vrot.lane.b32.xlu1 %v1464_v0, %s3177_s27 }
 0x1ef   :  { %1563 = vrot.lane.b32.xlu0 %v1465_v2, %s3178_s28  ;;  %1517 = vrot.lane.b32.xlu1 %v1466_v40, %s3177_s27 }
 0x1f3   :  { %1603 = vrot.lane.b32.xlu0 %v1463_v36, %s3179_s29  ;;  %1561 = vrot.lane.b32.xlu1 %v1464_v0, %s3178_s28 }
 0x1f7   :  { %1607 = vrot.lane.b32.xlu0 %v1465_v2, %s3179_s29  ;;  %1565 = vrot.lane.b32.xlu1 %v1466_v40, %s3178_s28 }
 0x1fb   :  { %1587 = vrot.lane.b32.xlu0 %v1463_v36, %s3180_s30  ;;  %1605 = vrot.lane.b32.xlu1 %v1464_v0, %s3179_s29 }
 0x1ff   :  { %1591 = vrot.lane.b32.xlu0 %v1465_v2, %s3180_s30  ;;  %1609 = vrot.lane.b32.xlu1 %v1466_v40, %s3179_s29 }
 0x203   :  { %1631 = vrot.lane.b32.xlu0 %v1463_v36, %s3181_s7  ;;  %1589 = vrot.lane.b32.xlu1 %v1464_v0, %s3180_s30 }
 0x207   :  { %1635 = vrot.lane.b32.xlu0 %v1465_v2, %s3181_s7  ;;  %1593 = vrot.lane.b32.xlu1 %v1466_v40, %s3180_s30 }
 0x20b   :  { %1731 = vperm.xlu0 %3171, %v1728_v18   ;;  %1633 = vrot.lane.b32.xlu1 %v1464_v0, %s3181_s7 }
 0x20f   :  { %1637 = vrot.lane.b32.xlu1 %v1466_v40, %s3181_s7 }
 0x241   :  { %v1488_v16 = vpop.permute.xlu0 %1487  ;;  %v1484_v5 = vpop.permute.xlu1 %1483 }
 0x245   :  { %v1528_v34 = vpop.permute.xlu0 %1527  ;;  %v1486_v28 = vpop.permute.xlu1 %1485 }
 0x246   :  { %v1492_v32 = vsel %vm58_vm0, %v1486_v28, %v1488_v16  ;;  %v1493_v1 = vsel %vm58_vm0, %v1484_v5, %v1486_v28 }
 0x247   :  { %v1500_v20 = vrot.slane %v1493_v1, 4  ;;  %v1501_v43 = vrot.slane %v1492_v32, 4  ;;  %v3958_v32 = vand.u32 4294901760, %v1735_v25 }
 0x249   :  { %1508 = vst [vmem:[#allocation2 + $0x8] sm:$0xf0] %v1500_v20  ;;  %1509 = vst [vmem:[#allocation2 + $0x10] sm:$0xf0] %v1501_v43  ;;  %v1532_v54 = vpop.permute.xlu0 %1531  ;;  %v1490_v13 = vpop.permute.xlu1 %1489  ;;  %v3985_v55 = vsub.f32 %v1735_v25, %v3958_v32 }
 0x24a   :  { %v1491_v39 = vsel %vm58_vm0, %v1488_v16, %v1490_v13  ;;  %v1494_v31 = vsel %vm58_vm0, %v1490_v13, %v1484_v5  ;;  %vm4496_vm0 = vcmp.lt.s32.totalorder %v3307_v6, 127 }
 0x24b   :  { %v1499_v9 = vrot.slane %v1494_v31, 4  ;;  %v1502_v27 = vrot.slane %v1491_v39, 4  ;;  %vm4502_vm12 = vmmov %vm4496_vm0 }
 0x24c   :  { %vm4503_vm13 = vmmov %vm4496_vm0 }
 0x24d   :  { %1507 = vst [vmem:[#allocation2] sm:$0xf0] %v1499_v9  ;;  %1510 = vst [vmem:[#allocation2 + $0x18] sm:$0xf0] %v1502_v27  ;;  %v1468_v37 = vpop.permute.xlu0 %1467  ;;  %v1530_v23 = vpop.permute.xlu1 %1529 }
 0x24e   :  { %v1536_v10 = vsel %vm104_vm1, %v1530_v23, %v1532_v54  ;;  %v1537_v50 = vsel %vm104_vm1, %v1528_v34, %v1530_v23  ;;  %v4506_v23 = vld [vmem:[#allocation7_spill] sm:$0xff] }
 0x24f   :  { %v1544_v4 = vrot.slane %v1537_v50, 4  ;;  %v1545_v57 = vrot.slane %v1536_v10, 4 }
 0x251   :  { %1552 = vst [vmem:[#allocation2 + $0x28] sm:$0xf0] %v1544_v4  ;;  %1553 = vst [vmem:[#allocation2 + $0x30] sm:$0xf0] %v1545_v57  ;;  %v1472_v33 = vpop.permute.xlu0 %1471  ;;  %v1534_v29 = vpop.permute.xlu1 %1533 }
 0x252   :  { %v1535_v60 = vsel %vm104_vm1, %v1532_v54, %v1534_v29  ;;  %v1538_v59 = vsel %vm104_vm1, %v1534_v29, %v1528_v34  ;;  %vm4497_vm1 = vmmov %vm4496_vm0 }
 0x253   :  { %v1543_v26 = vrot.slane %v1538_v59, 4  ;;  %v1546_v38 = vrot.slane %v1535_v60, 4 }
 0x255   :  { %1551 = vst [vmem:[#allocation2 + $0x20] sm:$0xf0] %v1543_v26  ;;  %1554 = vst [vmem:[#allocation2 + $0x38] sm:$0xf0] %v1546_v38  ;;  %v1512_v51 = vpop.permute.xlu0 %1511  ;;  %v1470_v48 = vpop.permute.xlu1 %1469 }
 0x256   :  { %v1476_v17 = vsel %vm41_vm2, %v1470_v48, %v1472_v33  ;;  %v1477_v8 = vsel %vm41_vm2, %v1468_v37, %v1470_v48 }
 0x257   :  { %1480 = vst [vmem:[#allocation2 + $0x8] sm:$0xf] %v1477_v8  ;;  %1481 = vst [vmem:[#allocation2 + $0x10] sm:$0xf] %v1476_v17 }
 0x259   :  { %v1516_v30 = vpop.permute.xlu0 %1515  ;;  %v1474_v3 = vpop.permute.xlu1 %1473 }
 0x25a   :  { %v1475_v62 = vsel %vm41_vm2, %v1472_v33, %v1474_v3  ;;  %v1478_v58 = vsel %vm41_vm2, %v1474_v3, %v1468_v37  ;;  %vm4498_vm2 = vcmp.gt.f32.partialorder %v3350_v47, 0.5 }
 0x25b   :  { %1479 = vst [vmem:[#allocation2] sm:$0xf] %v1478_v58  ;;  %1482 = vst [vmem:[#allocation2 + $0x18] sm:$0xf] %v1475_v62 }
 0x25d   :  { %v1560_v14 = vpop.permute.xlu0 %1559  ;;  %v1514_v15 = vpop.permute.xlu1 %1513 }
 0x25e   :  { %v1520_v41 = vsel %vm87_vm3, %v1514_v15, %v1516_v30  ;;  %v1521_v21 = vsel %vm87_vm3, %v1512_v51, %v1514_v15  ;;  %v1688_v42 = vld [vmem:[#allocation2 + $0x8] sm:$0xff]  ;;  %v1689_v24 = vld [vmem:[#allocation2 + $0x10] sm:$0xff] }
 0x25f   :  { %1524 = vst [vmem:[#allocation2 + $0x28] sm:$0xf] %v1521_v21  ;;  %1525 = vst [vmem:[#allocation2 + $0x30] sm:$0xf] %v1520_v41  ;;  %v1708_v7 = vsel %vm242_vm4, %v1688_v42, 0.0  ;;  %vm4500_vm4 = vcmp.gt.f32.partialorder %v3382_v56, 0.5 }
 0x260   :  { %v1749_v44 = vand.u32 4294901760, %v1708_v7  ;;  %v1709_v54 = vsel %vm4500_vm4, %v1689_v24, 0.0  ;;  %v4512_v42 = vld [vmem:[#allocation9_spill] sm:$0xff] }
 0x261   :  { %v1564_v19 = vpop.permute.xlu0 %1563  ;;  %v1518_v12 = vpop.permute.xlu1 %1517  ;;  %v2320_v59 = vand.u32 4294901760, %v1709_v54 }
 0x262   :  { %v1519_v63 = vsel %vm87_vm3, %v1516_v30, %v1518_v12  ;;  %v1522_v22 = vsel %vm87_vm3, %v1518_v12, %v1512_v51  ;;  %v1687_v0 = vld [vmem:[#allocation2] sm:$0xff]  ;;  %v1690_v34 = vld [vmem:[#allocation2 + $0x18] sm:$0xff]  ;;  %vm4499_vm3 = vcmp.gt.f32.partialorder %v3363_v52, 0.5  ;;  %v4000_v62 = vsub.f32 %v1708_v7, %v1749_v44 }
 0x263   :  { %1523 = vst [vmem:[#allocation2 + $0x20] sm:$0xf] %v1522_v22  ;;  %1526 = vst [vmem:[#allocation2 + $0x38] sm:$0xf] %v1519_v63  ;;  %v1707_v43 = vsel %vm4499_vm3, %v1687_v0, 0.0  ;;  %v1710_v52 = vsel %vm4504_vm14, %v1690_v34, 0.0 }
 0x264   :  { %v1751_v50 = vand.u32 4294901760, %v1707_v43  ;;  %v2318_v60 = vand.u32 4294901760, %v1710_v52  ;;  %v4023_v7 = vand.u32 4294901760, %v3985_v55  ;;  %v1837_v0 = vand.u32 4294901760, %v4000_v62 }
 0x265   :  { %v3947_v46 = vpop.permute.xlu0 %1603  ;;  %v1562_v49 = vpop.permute.xlu1 %1561 }
 0x266   :  { %v1568_v35 = vsel %vm4496_vm0, %v1562_v49, %v1564_v19  ;;  %v1569_v2 = vsel %vm4497_vm1, %v1560_v14, %v1562_v49  ;;  %v1692_v36 = vld [vmem:[#allocation2 + $0x28] sm:$0xff]  ;;  %v1693_v40 = vld [vmem:[#allocation2 + $0x30] sm:$0xff]  ;;  %vm4507_vm0 = vcmp.gt.f32.partialorder %v4506_v23, 0.5  ;;  %vm4508_vm1 = vcmp.lt.s32.totalorder %v3307_v6, 112 }
 0x267   :  { %v1575_v18 = vrot.slane %v1569_v2, 4  ;;  %v1576_v16 = vrot.slane %v1568_v35, 4  ;;  %v1712_v5 = vsel %vm4498_vm2, %v1692_v36, 0.0  ;;  %v3966_v13 = vsel %vm4501_vm6, %v1693_v40, 0.0  ;;  %vm4509_vm2 = vmmov %vm4508_vm1 }
 0x268   :  { %v1753_v28 = vand.u32 4294901760, %v1712_v5  ;;  %v2324_v33 = vand.u32 4294901760, %v3966_v13  ;;  %v4003_v58 = vsub.f32 %v1707_v43, %v1751_v50  ;;  %v4008_v41 = vsub.f32 %v1710_v52, %v2318_v60  ;;  %vm4510_vm3 = vmmov %vm4508_vm1 }
 0x269   :  { %1583 = vst [vmem:[#allocation2 + $0x40] sm:$0xf0] %v1575_v18  ;;  %1584 = vst [vmem:[#allocation2 + $0x48] sm:$0xf0] %v1576_v16  ;;  %v1608_v1 = vpop.permute.xlu0 %1607  ;;  %v1566_v20 = vpop.permute.xlu1 %1565  ;;  %vm4513_vm6 = vcmp.gt.f32.partialorder %v4512_v42, 0.5  ;;  %v4514_v16 = vld [vmem:[#allocation8_spill] sm:$0xff]  ;;  %v1838_v52 = vsub.f32 %v4000_v62, %v1837_v0 }
 0x26a   :  { %v1567_v47 = vsel %vm4502_vm12, %v1564_v19, %v1566_v20  ;;  %v1570_v39 = vsel %vm4503_vm13, %v1566_v20, %v1560_v14  ;;  %v3972_v31 = vpack.c.bf16 %v1753_v28, %v1749_v44  ;;  %v1691_v9 = vld [vmem:[#allocation2 + $0x20] sm:$0xff]  ;;  %v1694_v27 = vld [vmem:[#allocation2 + $0x38] sm:$0xff]  ;;  %v3987_v26 = vsub.f32 %v1712_v5, %v1753_v28  ;;  %vm4511_vm4 = vmmov %vm4508_vm1 }
 0x26b   :  { %v1577_v37 = vrot.slane %v1567_v47, 4  ;;  %v1578_v56 = vrot.slane %v1570_v39, 4  ;;  %v1711_v61 = vsel %vm4505_vm15, %v1691_v9, 0.0  ;;  %v1714_v10 = vsel %vm4507_vm0, %v1694_v27, 0.0 }
 0x26c   :  { %3018 = vmatprep.subr.bf16.mxu0 %v3972_v31  ;;  %v1755_v4 = vand.u32 4294901760, %v1711_v61  ;;  %v2322_v57 = vand.u32 4294901760, %v1714_v10  ;;  %v4005_v14 = vpack.c.bf16 %v2324_v33, %v2320_v59  ;;  %v4010_v19 = vsub.f32 %v1709_v54, %v2320_v59 }
 0x26d   :  { %1585 = vst [vmem:[#allocation2 + $0x50] sm:$0xf0] %v1577_v37  ;;  %1586 = vst [vmem:[#allocation2 + $0x58] sm:$0xf0] %v1578_v56  ;;  %v3982_v29 = vpop.permute.xlu0 %1587  ;;  %v1606_v53 = vpop.permute.xlu1 %1605  ;;  %v1849_v35 = vand.u32 4294901760, %v3987_v26  ;;  %vm4515_vm12 = vcmp.gt.f32.partialorder %v4514_v16, 0.5  ;;  %v1827_v39 = vsub.f32 %v3985_v55, %v4023_v7 }
 0x26e   :  { %v1612_v38 = vsel %vm4508_vm1, %v1606_v53, %v1608_v1  ;;  %v1613_v51 = vsel %vm4509_vm2, %v3947_v46, %v1606_v53  ;;  %v3994_v48 = vpack.c.bf16 %v1755_v4, %v1751_v50  ;;  %v3996_v30 = vsub.f32 %v1711_v61, %v1755_v4  ;;  %v4072_v50 = vld [vmem:[%s4402_s5 + $0x88] sm:$0xf]  ;;  %v4077_v4 = vld [vmem:[%s4402_s5 + $0x80] sm:$0xf]  ;;  %v4127_v16 = vld [vmem:[%s4402_s5 + $0x90] sm:$0xf] }
 0x26f   :  { %v1619_v17 = vrot.slane %v1613_v51, 4  ;;  %v1620_v8 = vrot.slane %v1612_v38, 4  ;;  %v3998_v3 = vpack.c.bf16 %v2322_v57, %v2318_v60  ;;  %v4027_v36 = vsub.f32 %v1714_v10, %v2322_v57  ;;  %v4520_v60 = vld [vmem:[#allocation10_spill] sm:$0xff]  ;;  %v4522_v38 = vld [vmem:[#allocation11_spill] sm:$0xff] }
 0x270   :  { %3020 = vmatpush1.bf16.msra.mxu0 %v3994_v48  ;;  %v1696_v15 = vld [vmem:[#allocation2 + $0x48] sm:$0xff]  ;;  %v1695_v49 = vld [vmem:[#allocation2 + $0x40] sm:$0xff]  ;;  %v4457_v2 = vand.u32 4294901760, %v3996_v30  ;;  %v4452_v34 = vand.u32 4294901760, %v4008_v41  ;;  %v4447_v44 = vand.u32 4294901760, %v4010_v19  ;;  %vm4516_vm13 = vcmp.lt.s32.totalorder %v3307_v6, 113 }
 0x271   :  { %1627 = vst [vmem:[#allocation2 + $0x60] sm:$0xf0] %v1619_v17  ;;  %1628 = vst [vmem:[#allocation2 + $0x68] sm:$0xf0] %v1620_v8  ;;  %3066 = vmatprep.subr.bf16.mxu1 %v3998_v3  ;;  %v1592_v21 = vpop.permute.xlu0 %1591  ;;  %v1610_v12 = vpop.permute.xlu1 %1609  ;;  %v4020_v45 = vsel %vm4513_vm6, %v1696_v15, 0.0  ;;  %v4034_v5 = vsel %vm4515_vm12, %v1695_v49, 0.0  ;;  %v1850_v47 = vsub.f32 %v3987_v26, %v1849_v35  ;;  %v4062_v61 = vsub.f32 %v3966_v13, %v2324_v33 }
 0x272   :  { %3068 = vmatpush1.bf16.msra.mxu1 %v4005_v14  ;;  %v1611_v63 = vsel %vm4510_vm3, %v1608_v1, %v1610_v12  ;;  %v1614_v22 = vsel %vm4511_vm4, %v1610_v12, %v3947_v46  ;;  %v1843_v46 = vand.u32 4294901760, %v4003_v58  ;;  %v1757_v18 = vand.u32 4294901760, %v4020_v45  ;;  %vm4517_vm14 = vmmov %vm4516_vm13 }
 0x273   :  { %v1621_v24 = vrot.slane %v1611_v63, 4  ;;  %v1622_v25 = vrot.slane %v1614_v22, 4  ;;  %v1856_v9 = vsub.f32 %v3996_v30, %v4457_v2  ;;  %v1759_v27 = vand.u32 4294901760, %v4034_v5  ;;  %vm4518_vm15 = vmmov %vm4516_vm13  ;;  %v4114_v63 = vld [vmem:[%s4402_s5 + $0x98] sm:$0xf] }
 0x274   :  { %v1698_v43 = vld [vmem:[#allocation2 + $0x58] sm:$0xff]  ;;  %v1697_v54 = vld [vmem:[#allocation2 + $0x50] sm:$0xff]  ;;  %v1844_v37 = vsub.f32 %v4003_v58, %v1843_v46  ;;  %v4449_v56 = vand.u32 4294901760, %v4027_v36  ;;  %v4067_v10 = vsub.f32 %v4020_v45, %v1757_v18  ;;  %v4082_v13 = vsub.f32 %v4008_v41, %v4452_v34  ;;  %vm4519_vm0 = vmmov %vm4516_vm13 }
 0x275   :  { %1629 = vst [vmem:[#allocation2 + $0x70] sm:$0xf0] %v1621_v24  ;;  %1630 = vst [vmem:[#allocation2 + $0x78] sm:$0xf0] %v1622_v25  ;;  %v1590_v40 = vpop.permute.xlu1 %1589  ;;  %v4043_v20 = vpop.permute.xlu0 %1631  ;;  %v4087_v57 = vsub.f32 %v4010_v19, %v4447_v44  ;;  %vm4521_vm1 = vcmp.gt.f32.partialorder %v4520_v60, 0.5  ;;  %vm4523_vm2 = vcmp.gt.f32.partialorder %v4522_v38, 0.5 }
 0x276   :  { %v1596_v28 = vsel %vm4516_vm13, %v1590_v40, %v1592_v21  ;;  %v1597_v1 = vsel %vm4517_vm14, %v3982_v29, %v1590_v40  ;;  %v4096_v59 = vsel %vm4521_vm1, %v1698_v43, 0.0  ;;  %v4100_v51 = vsel %vm4523_vm2, %v1697_v54, 0.0 }
 0x277   :  { %1599 = vst [vmem:[#allocation2 + $0x60] sm:$0xf] %v1597_v1  ;;  %1600 = vst [vmem:[#allocation2 + $0x68] sm:$0xf] %v1596_v28  ;;  %v1851_v17 = vand.u32 4294901760, %v1850_v47  ;;  %v4102_v8 = vand.u32 4294901760, %v1827_v39  ;;  %v4119_v22 = vsub.f32 %v4027_v36, %v4449_v56 }
 0x278   :  { %v1857_v15 = vand.u32 4294901760, %v1856_v9  ;;  %vm1684_vm3 = vcmp.gt.f32.partialorder %v4072_v50, 0.5  ;;  %vm1683_vm4 = vcmp.gt.f32.partialorder %v4077_v4, 0.5  ;;  %v1845_v12 = vand.u32 4294901760, %v1844_v37 }
 0x279   :  { %v1594_v23 = vpop.permute.xlu1 %1593  ;;  %v1636_v42 = vpop.permute.xlu0 %1635  ;;  %v2326_v24 = vand.u32 4294901760, %v4096_v59  ;;  %v2328_v25 = vand.u32 4294901760, %v4100_v51  ;;  %v4454_v40 = vand.u32 4294901760, %v4067_v10  ;;  %v4448_v28 = vand.u32 4294901760, %v4062_v61 }
 0x27a   :  { %v1595_v33 = vsel %vm4518_vm15, %v1592_v21, %v1594_v23  ;;  %v1598_v53 = vsel %vm4519_vm0, %v1594_v23, %v3982_v29  ;;  %v4107_v21 = vsub.f32 %v4034_v5, %v1759_v27  ;;  %v1839_v29 = vand.u32 4294901760, %v1838_v52 }
 0x27b   :  { %1601 = vst [vmem:[#allocation2 + $0x70] sm:$0xf] %v1595_v33  ;;  %1602 = vst [vmem:[#allocation2 + $0x78] sm:$0xf] %v1598_v53  ;;  %v2408_v39 = vand.u32 4294901760, %v4082_v13  ;;  %v2414_v9 = vand.u32 4294901760, %v4087_v57  ;;  %v4143_v60 = vpack.c.bf16 %v1857_v15, %v1845_v12  ;;  %v4161_v15 = vsub.f32 %v4062_v61, %v4448_v28 }
 0x27c   :  { %v4141_v53 = vpack.c.bf16 %v1851_v17, %v1839_v29  ;;  %vm1686_vm6 = vcmp.gt.f32.partialorder %v4114_v63, 0.5  ;;  %vm1685_vm12 = vcmp.gt.f32.partialorder %v4127_v16, 0.5  ;;  %v2420_v44 = vand.u32 4294901760, %v4119_v22 }
 0x27d   :  { %v1634_v49 = vpop.permute.xlu1 %1633  ;;  %v1862_v17 = vsub.f32 %v4067_v10, %v4454_v40 }
 0x27e   :  { %v1640_v1 = vsel %vm212_vm9, %v1634_v49, %v1636_v42  ;;  %v1641_v43 = vsel %vm212_vm9, %v4043_v20, %v1634_v49  ;;  %v1700_v54 = vld [vmem:[#allocation2 + $0x68] sm:$0xff]  ;;  %v1699_v47 = vld [vmem:[#allocation2 + $0x60] sm:$0xff] }
 0x27f   :  { %1643 = vst [vmem:[#allocation2 + $0x80] sm:$0xf] %v1641_v43  ;;  %1644 = vst [vmem:[#allocation2 + $0x88] sm:$0xf] %v1640_v1  ;;  %v1720_v37 = vsel %vm254_vm8, %v1700_v54, 0.0  ;;  %v1719_v33 = vsel %vm253_vm11, %v1699_v47, 0.0  ;;  %v4150_v54 = vsub.f32 %v4096_v59, %v2326_v24  ;;  %v4153_v47 = vsub.f32 %v4100_v51, %v2328_v25 }
 0x280   :  { %v1761_v38 = vand.u32 4294901760, %v1720_v37  ;;  %v1763_v49 = vand.u32 4294901760, %v1719_v33  ;;  %v4450_v1 = vand.u32 4294901760, %v4107_v21 }
 0x281   :  { %v1638_v43 = vpop.permute.xlu1 %1637 }
 0x282   :  { %v1639_v29 = vsel %vm212_vm9, %v1636_v42, %v1638_v43  ;;  %v1642_v59 = vsel %vm212_vm9, %v1638_v43, %v4043_v20  ;;  %v4170_v51 = vpack.c.bf16 %v1761_v38, %v1757_v18  ;;  %v4172_v12 = vsub.f32 %v1720_v37, %v1761_v38  ;;  %v1702_v52 = vld [vmem:[#allocation2 + $0x78] sm:$0xff]  ;;  %v1701_v23 = vld [vmem:[#allocation2 + $0x70] sm:$0xff] }
 0x283   :  { %1645 = vst [vmem:[#allocation2 + $0x90] sm:$0xf] %v1639_v29  ;;  %1646 = vst [vmem:[#allocation2 + $0x98] sm:$0xf] %v1642_v59  ;;  %v4176_v28 = vpack.c.bf16 %v1763_v49, %v1759_v27  ;;  %v4178_v56 = vsub.f32 %v1719_v33, %v1763_v49  ;;  %v1722_v6 = vsel %vm256_vm7, %v1702_v52, 0.0  ;;  %v1721_v45 = vsel %vm255_vm5, %v1701_v23, 0.0 }
 0x284   :  { %3022 = vmatprep.subr.bf16.mxu0 %v4170_v51  ;;  %v2330_v18 = vand.u32 4294901760, %v1722_v6  ;;  %v2332_v37 = vand.u32 4294901760, %v1721_v45  ;;  %v4453_v38 = vand.u32 4294901760, %v4172_v12  ;;  %v1868_v5 = vsub.f32 %v4107_v21, %v4450_v1 }
 0x285   :  { %3024 = vmatpush1.bf16.msra.mxu0 %v4176_v28  ;;  %v1863_v27 = vand.u32 4294901760, %v1862_v17  ;;  %v4451_v33 = vand.u32 4294901760, %v4178_v56  ;;  %v2426_v49 = vand.u32 4294901760, %v4161_v15  ;;  %v4456_v43 = vand.u32 4294901760, %v4150_v54 }
 0x286   :  { %v4193_v29 = vpack.c.bf16 %v2330_v18, %v2326_v24  ;;  %v4195_v59 = vsub.f32 %v1722_v6, %v2330_v18  ;;  %v4197_v52 = vpack.c.bf16 %v2332_v37, %v2328_v25  ;;  %v4199_v23 = vsub.f32 %v1721_v45, %v2332_v37  ;;  %v1704_v42 = vld [vmem:[#allocation2 + $0x88] sm:$0xf]  ;;  %v1703_v20 = vld [vmem:[#allocation2 + $0x80] sm:$0xf] }
 0x287   :  { %v1724_v1 = vsel %vm1684_vm3, %v1704_v42, 0.0  ;;  %v1723_v17 = vsel %vm1683_vm4, %v1703_v20, 0.0  ;;  %v1874_v15 = vsub.f32 %v4172_v12, %v4453_v38  ;;  %v1880_v24 = vsub.f32 %v4178_v56, %v4451_v33 }
 0x288   :  { %3070 = vmatprep.subr.bf16.mxu1 %v4193_v29  ;;  %v1741_v25 = vsel %vm312_vm10, %v1724_v1, 0  ;;  %v1738_v6 = vsel %vm312_vm10, %v1723_v17, 0  ;;  %v4455_v50 = vand.u32 4294901760, %v4195_v59  ;;  %v2448_v45 = vand.u32 4294901760, %v4199_v23 }
 0x289   :  { %3072 = vmatpush1.bf16.msra.mxu1 %v4197_v52  ;;  %v4217_v4 = vand.u32 4294901760, %v1741_v25  ;;  %v4219_v18 = vand.u32 4294901760, %v1738_v6  ;;  %v1875_v37 = vand.u32 4294901760, %v1874_v15  ;;  %v1869_v42 = vand.u32 4294901760, %v1868_v5 }
 0x28a   :  { %v1706_v20 = vld [vmem:[#allocation2 + $0x98] sm:$0xf]  ;;  %v1705_v33 = vld [vmem:[#allocation2 + $0x90] sm:$0xf]  ;;  %v1881_v34 = vand.u32 4294901760, %v1880_v24  ;;  %v2431_v1 = vsub.f32 %v4150_v54, %v4456_v43  ;;  %v2443_v17 = vsub.f32 %v4195_v59, %v4455_v50  ;;  %v2436_v38 = vand.u32 4294901760, %v4153_v47 }
 0x28b   :  { %1766 = vmatprep.subr.mxu0 %v4217_v4  ;;  %v4230_v40 = vsub.f32 %v1738_v6, %v4219_v18  ;;  %v1726_v5 = vsel %vm1686_vm6, %v1706_v20, 0.0  ;;  %v1725_v15 = vsel %vm1685_vm12, %v1705_v33, 0.0  ;;  %v2449_v24 = vsub.f32 %v4199_v23, %v2448_v45 }
 0x28c   :  { %1768 = vmatpush1.msra.mxu0 %v4219_v18  ;;  %v3029_v50 = vpack.c.bf16 %v1875_v37, %v1863_v27  ;;  %v1747_v43 = vsel %vm312_vm10, %v1726_v5, 0  ;;  %v1744_v2 = vsel %vm312_vm10, %v1725_v15, 0  ;;  %v4243_v6 = vsub.f32 %v1741_v25, %v4217_v4 }
 0x28d   :  { %3026 = vmatprep.subr.bf16.mxu0 %v4141_v53  ;;  %1829 = vmatmul.mubr.f32.vlgmr.msra.gmra.mrb[2].mxu0 %v4102_v8  ;;  %v4247_v63 = vand.u32 4294901760, %v1747_v43  ;;  %v4249_v16 = vand.u32 4294901760, %v1744_v2  ;;  %v2444_v33 = vand.u32 4294901760, %v2443_v17  ;;  %v1891_v20 = vand.u32 4294901760, %v4230_v40 }
 0x28e   :  { %3028 = vmatpush1.bf16.msra.mxu0 %v4143_v60  ;;  %v3073_v27 = vpack.c.bf16 %v2420_v44, %v2408_v39  ;;  %v1885_v25 = vand.u32 4294901760, %v4243_v6  ;;  %v2437_v53 = vsub.f32 %v4153_v47, %v2436_v38  ;;  %1949 = vmatprep.mubr.f32.mxu0 %v4479_v11  ;;  %v3031_v60 = vpack.c.bf16 %v1881_v34, %v1869_v42 }
 0x28f   :  { %3030 = vmatprep.subr.bf16.mxu0 %v3029_v50  ;;  %2335 = vmatprep.subr.mxu1 %v4247_v63  ;;  %v4264_v37 = vsub.f32 %v1744_v2, %v4249_v16  ;;  %v3075_v13 = vpack.c.bf16 %v2426_v49, %v2414_v9  ;;  %v2432_v22 = vand.u32 4294901760, %v2431_v1  ;;  %v1892_v39 = vsub.f32 %v4230_v40, %v1891_v20 }
 0x290   :  { %2337 = vmatpush1.msra.mxu1 %v4249_v16  ;;  %v1886_v44 = vsub.f32 %v4243_v6, %v1885_v25  ;;  %v2450_v50 = vand.u32 4294901760, %v2449_v24  ;;  %v4276_v17 = vsub.f32 %v1747_v43, %v4247_v63  ;;  %v2438_v9 = vand.u32 4294901760, %v2437_v53 }
 0x291   :  { %3074 = vmatprep.subr.bf16.mxu1 %v3073_v27  ;;  %2398 = vmatmul.mubr.f32.vlgmr.msra.gmra.mrb[2].mxu1 %v4102_v8  ;;  %v3077_v2 = vpack.c.bf16 %v2444_v33, %v2432_v22  ;;  %v2460_v34 = vand.u32 4294901760, %v4264_v37  ;;  %v1893_v42 = vand.u32 4294901760, %v1892_v39  ;;  %v3033_v5 = vpack.c.bf16 %v3987_v26, %v4000_v62 }
 0x292   :  { %3032 = vmatpush1.bf16.msra.mxu0 %v3031_v60  ;;  %3076 = vmatpush1.bf16.msra.mxu1 %v3075_v13  ;;  %v1887_v57 = vand.u32 4294901760, %v1886_v44  ;;  %v2454_v49 = vand.u32 4294901760, %v4276_v17  ;;  %v3079_v1 = vpack.c.bf16 %v2450_v50, %v2438_v9  ;;  %v3035_v24 = vpack.c.bf16 %v3996_v30, %v4003_v58 }
 0x293   :  { %3078 = vmatprep.subr.bf16.mxu1 %v3077_v2  ;;  %2518 = vmatprep.mubr.f32.mxu1 %v4479_v11  ;;  %v2461_v8 = vsub.f32 %v4264_v37, %v2460_v34  ;;  %v3037_v33 = vpack.c.bf16 %v4172_v12, %v4067_v10  ;;  %v3081_v53 = vpack.c.bf16 %v4027_v36, %v4008_v41  ;;  %v4529_v2 = vand.u32 4294901760, %v4067_v10 }
 0x294   :  { %1888 = vmatprep.subr.mxu0 %v1887_v57  ;;  %v2455_v43 = vsub.f32 %v4276_v17, %v2454_v49  ;;  %v3039_v60 = vpack.c.bf16 %v4178_v56, %v4107_v21  ;;  %v3083_v13 = vpack.c.bf16 %v4062_v61, %v4010_v19  ;;  %v3085_v22 = vpack.c.bf16 %v4195_v59, %v4150_v54 }
 0x295   :  { %v2462_v27 = vand.u32 4294901760, %v2461_v8  ;;  %v3087_v44 = vpack.c.bf16 %v4199_v23, %v4153_v47  ;;  %v3049_v39 = vpack.c.bf16 %v1849_v35, %v1837_v0  ;;  %v4530_v57 = vand.u32 4294901760, %v4172_v12  ;;  %v4541_v23 = vld [vmem:[#allocation3_spill] sm:$0xff] }
 0x296   :  { %1894 = vmatpush1.msra.mxu0 %v1893_v42  ;;  %3080 = vmatpush1.bf16.msra.mxu1 %v3079_v1  ;;  %v2456_v15 = vand.u32 4294901760, %v2455_v43  ;;  %v4531_v26 = vand.u32 4294901760, %v4008_v41  ;;  %v4532_v35 = vand.u32 4294901760, %v4027_v36  ;;  %v4534_v58 = vand.u32 4294901760, %v4062_v61 }
 0x297   :  { %3034 = vmatprep.subr.bf16.mxu0 %v3033_v5  ;;  %1951 = vmatmul.mubr.f32.vlgmr.msra.gmra.mrb[2].mxu0 %v3958_v32  ;;  %v3053_v62 = vpack.c.bf16 %v4530_v57, %v4529_v2  ;;  %v4535_v10 = vand.u32 4294901760, %v4107_v21  ;;  %v4536_v12 = vand.u32 4294901760, %v4178_v56  ;;  %v4537_v41 = vand.u32 4294901760, %v4150_v54 }
 0x298   :  { %2457 = vmatprep.subr.mxu1 %v2456_v15  ;;  %3036 = vmatpush1.bf16.msra.mxu0 %v3035_v24  ;;  %v3097_v0 = vpack.c.bf16 %v4532_v35, %v4531_v26  ;;  %v4538_v36 = vand.u32 4294901760, %v4195_v59 }
 0x299   :  { %3038 = vmatprep.subr.bf16.mxu0 %v3037_v33  ;;  %2041 = vmatprep.mubr.f32.mxu0 %v4479_v11  ;;  %v3055_v9 = vpack.c.bf16 %v4536_v12, %v4535_v10 }
 0x29a   :  { %2463 = vmatpush1.msra.mxu1 %v2462_v27  ;;  %v3101_v42 = vpack.c.bf16 %v4538_v36, %v4537_v41 }
 0x29b   :  { %3082 = vmatprep.subr.bf16.mxu1 %v3081_v53  ;;  %2520 = vmatmul.mubr.f32.vlgmr.msra.gmra.mrb[2].mxu1 %v3958_v32 }
 0x29c   :  { %3040 = vmatpush1.bf16.msra.mxu0 %v3039_v60  ;;  %3084 = vmatpush1.bf16.msra.mxu1 %v3083_v13 }
 0x29d   :  { %1983 = vmatprep.subr.mxu0 %v4243_v6  ;;  %3086 = vmatprep.subr.bf16.mxu1 %v3085_v22 }
 0x29e   :  { %2610 = vmatprep.mubr.f32.mxu1 %v4479_v11 }
 0x2a0   :  { %1986 = vmatpush1.msra.mxu0 %v4230_v40  ;;  %3088 = vmatpush1.bf16.msra.mxu1 %v3087_v44 }
 0x2a1   :  { %3042 = vmatprep.subr.bf16.mxu0 %v3972_v31  ;;  %2552 = vmatprep.subr.mxu1 %v4276_v17 }
 0x2a2   :  { %2044 = vmatmul.mubr.f32.vlgmr.msra.gmra.mrb[2].mxu0 %v3985_v55 }
 0x2a3   :  { %3044 = vmatpush1.bf16.msra.mxu0 %v3994_v48  ;;  %2124 = vmatprep.mubr.f32.mxu0 %v4479_v11 }
 0x2a4   :  { %3046 = vmatprep.subr.bf16.mxu0 %v4170_v51  ;;  %2555 = vmatpush1.msra.mxu1 %v4264_v37 }
 0x2a5   :  { %3090 = vmatprep.subr.bf16.mxu1 %v3998_v3  ;;  %2613 = vmatmul.mubr.f32.vlgmr.msra.gmra.mrb[2].mxu1 %v3985_v55  ;;  %v4528_v55 = vand.u32 4294901760, %v3996_v30  ;;  %v4533_v30 = vand.u32 4294901760, %v4010_v19  ;;  %v3103_v19 = vpack.c.bf16 %v2448_v45, %v2436_v38 }
 0x2a6   :  { %3092 = vmatpush1.bf16.msra.mxu1 %v4005_v14  ;;  %2693 = vmatprep.mubr.f32.mxu1 %v4479_v11 }
 0x2a7   :  { %3048 = vmatpush1.bf16.msra.mxu0 %v4176_v28  ;;  %3094 = vmatprep.subr.bf16.mxu1 %v4193_v29  ;;  %v3051_v50 = vpack.c.bf16 %v4528_v55, %v1843_v46  ;;  %v3099_v46 = vpack.c.bf16 %v4534_v58, %v4533_v30 }
 0x2a8   :  { %2067 = vmatprep.subr.mxu0 %v4217_v4 }
 0x2aa   :  { %3096 = vmatpush1.bf16.msra.mxu1 %v4197_v52 }
 0x2ab   :  { %2069 = vmatpush1.msra.mxu0 %v4219_v18  ;;  %2636 = vmatprep.subr.mxu1 %v4247_v63 }
 0x2ac   :  { %3050 = vmatprep.subr.bf16.mxu0 %v3049_v39  ;;  %2128 = vmatmul.mubr.f32.vlgmr.msra.gmra.mrb[2].mxu0 %v4023_v7 }
 0x2ad   :  { %3052 = vmatpush1.bf16.msra.mxu0 %v3051_v50  ;;  %2228 = vmatprep.mubr.f32.mxu0 %v4479_v11 }
 0x2ae   :  { %3054 = vmatprep.subr.bf16.mxu0 %v3053_v62  ;;  %2638 = vmatpush1.msra.mxu1 %v4249_v16 }
 0x2af   :  { %3098 = vmatprep.subr.bf16.mxu1 %v3097_v0  ;;  %2697 = vmatmul.mubr.f32.vlgmr.msra.gmra.mrb[2].mxu1 %v4023_v7 }
 0x2b0   :  { %3100 = vmatpush1.bf16.msra.mxu1 %v3099_v46  ;;  %2797 = vmatprep.mubr.f32.mxu1 %v4479_v11 }
 0x2b1   :  { %3056 = vmatpush1.bf16.msra.mxu0 %v3055_v9  ;;  %3102 = vmatprep.subr.bf16.mxu1 %v3101_v42 }
 0x2b2   :  { %2169 = vmatprep.subr.mxu0 %v1885_v25 }
 0x2b4   :  { %3104 = vmatpush1.bf16.msra.mxu1 %v3103_v19 }
 0x2b5   :  { %2173 = vmatpush1.msra.mxu0 %v1891_v20  ;;  %2738 = vmatprep.subr.mxu1 %v2454_v49 }
 0x2b6   :  { %3058 = vmatprep.subr.bf16.mxu0 %v3972_v31  ;;  %2230 = vmatmul.mubr.f32.vlgmr.msra.gmra.mrb[2].mxu0 %v3958_v32  ;;  %v1732_v31 = vpop.permute.xlu0 %1731 }
 0x2b7   :  { %3060 = vmatpush1.bf16.msra.mxu0 %v3994_v48  ;;  %2310 = vmatprep.mubr.f32.mxu0 %v4479_v11 }
 0x2b8   :  { %3062 = vmatprep.subr.bf16.mxu0 %v4170_v51  ;;  %2742 = vmatpush1.msra.mxu1 %v2460_v34  ;;  %v4540_v51 = vld [vmem:[#allocation6_spill] sm:$0xff] }
 0x2b9   :  { %3106 = vmatprep.subr.bf16.mxu1 %v3998_v3  ;;  %2799 = vmatmul.mubr.f32.vlgmr.msra.gmra.mrb[2].mxu1 %v3958_v32 }
 0x2ba   :  { %3108 = vmatpush1.bf16.msra.mxu1 %v4005_v14  ;;  %2879 = vmatprep.mubr.f32.mxu1 %v4479_v11 }
 0x2bb   :  { %3064 = vmatpush1.bf16.msra.mxu0 %v4176_v28  ;;  %3110 = vmatprep.subr.bf16.mxu1 %v4193_v29  ;;  %v4539_v28 = vld [vmem:[#allocation4_spill] sm:$0xff] }
 0x2bc   :  { %2253 = vmatprep.subr.mxu0 %v4217_v4 }
 0x2be   :  { %3112 = vmatpush1.bf16.msra.mxu1 %v4197_v52 }
 0x2bf   :  { %2255 = vmatpush1.msra.mxu0 %v4219_v18  ;;  %2822 = vmatprep.subr.mxu1 %v4247_v63  ;;  %v4542_v18 = vld [vmem:[#allocation5_spill] sm:$0xff] }
 0x2c0   :  { %2312 = vmatmul.mubr.f32.vlgmr.msra.gmra.mrb[2].mxu0 %v3958_v32 }
 0x2c2   :  { %2824 = vmatpush1.msra.mxu1 %v4249_v16 }
 0x2c3   :  { %2881 = vmatmul.mubr.f32.vlgmr.msra.gmra.mrb[2].mxu1 %v3958_v32 }
 0x393   :  { %v2313_v11 = vpop.f32.mrb[2].mxu0 }
 0x394   :  { %v3117_v48 = vadd.f32 %v2313_v11, %v1732_v31  ;;  %v2315_v3 = vpop.f32.mrb[3].mxu0 }
 0x395   :  { %v3118_v14 = vadd.f32 %v2315_v3, %v1732_v31 }
 0x396   :  { %v2887_v7 = vmax.f32 %v3117_v48, 0.0  ;;  %v2882_v56 = vpop.f32.mrb[2].mxu1 }
 0x397   :  { %v2888_v61 = vmax.f32 %v3118_v14, 0.0  ;;  %v3119_v21 = vadd.f32 %v2882_v56, %v1732_v31  ;;  %v2884_v40 = vpop.f32.mrb[3].mxu1 }
 0x398   :  { %v2891_v54 = vadd.f32 %v2887_v7, %v4539_v28  ;;  %v3120_v47 = vadd.f32 %v2884_v40, %v1732_v31 }
 0x399   :  { %v2892_v38 = vadd.f32 %v2888_v61, %v4540_v51  ;;  %v2889_v29 = vmax.f32 %v3119_v21, 0.0 }
 0x39a   :  { %vm2895_vm5 = vcmp.ge.f32.partialorder %v2891_v54, 0.0  ;;  %v2899_v59 = vmul.f32 0.01, %v2891_v54  ;;  %v2890_v52 = vmax.f32 %v3120_v47, 0.0 }
 0x39b   :  { %vm2896_vm7 = vcmp.ge.f32.partialorder %v2892_v38, 0.0  ;;  %v2900_v32 = vmul.f32 0.01, %v2892_v38  ;;  %v2893_v45 = vadd.f32 %v2889_v29, %v4541_v23 }
 0x39c   :  { %v2903_v4 = vsel %vm2895_vm5, %v2891_v54, %v2899_v59  ;;  %v2894_v6 = vadd.f32 %v2890_v52, %v4542_v18 }
 0x39d   :  { %v2904_v63 = vsel %vm2896_vm7, %v2892_v38, %v2900_v32  ;;  %vm2897_vm8 = vcmp.ge.f32.partialorder %v2893_v45, 0.0  ;;  %v2901_v16 = vmul.f32 0.01, %v2893_v45 }
 0x39e   :  { %v2911_v20 = vcombine.low %v2903_v4, %v2904_v63  ;;  %vm2898_vm9 = vcmp.ge.f32.partialorder %v2894_v6, 0.0  ;;  %v2902_v25 = vmul.f32 0.01, %v2894_v6 }
 0x39f   :  { %v2905_v37 = vsel %vm2897_vm8, %v2893_v45, %v2901_v16 }
 0x3a0   :  { %2915 = vst [vmem:[%s4406_s6] sm:$0xff] %v2911_v20  ;;  %v2906_v17 = vsel %vm2898_vm9, %v2894_v6, %v2902_v25 }
 0x3a1   :  { %v2912_v34 = vcombine.low %v2905_v37, %v2906_v17 }
 0x3a3   :  { %2916 = vst [vmem:[%s4406_s6 + $0x8] sm:$0xff] %v2912_v34 }

</bundles_post_ra>
